<compile_context>
chip_gen: v7x
topology: tpu7x:2x2x1
jax: 0.10.0
libtpu: 0.0.40
codegen_flags: <defaults>
</compile_context>

<pallas_src>
import functools
import math

import jax
import jax.numpy as jnp
from jax import lax
from jax.experimental import pallas as pl
from jax.experimental.pallas import tpu as pltpu

# ----------------------------- small (scaled-down) config ---------------------------
N_BATCH = 2          # batch
IN_H, IN_W = 16, 22  # EEG "image" (channels x time)
C_CONV = 8           # conv_out_channels (256 in the real model)
K_W = 6              # conv kernel width (36 real); stride == kernel
PAD_W = 2            # conv padding (0, 2)
PATCH_H = 4          # patch_size = (PATCH_H, 1)
D_EMB = 32           # embedding_dim (768 real); D_EMB % C_CONV == 0
N_HEADS = 4
N_LAYERS = 2
D_FF = 64            # ViT intermediate size
HIDDEN = 16          # classifier hidden_size (1000 real)
NUM_CLASSES = 1
LN_EPS = 1e-12       # HF ViT layer_norm_eps
BN_EPS = 0.0         # nn.BatchNorm2d(C, False) -> eps = False == 0.0

OUT_W = (IN_W + 2 * PAD_W - K_W) // K_W + 1
N_PATCH_H = IN_H // PATCH_H
NUM_PATCHES = N_PATCH_H * OUT_W
SEQ = NUM_PATCHES + 1
HEAD_DIM = D_EMB // N_HEADS
ATTN_SCALE = 1.0 / math.sqrt(HEAD_DIM)


# ------------------------------ fused encoder kernel --------------------------------
def _encoder_kernel(x_ref, wqkv_ref, bqkv_ref, wo_ref, w1_ref, b1_ref, w2_ref,
                    vecd_ref, o_ref, *, n_heads, head_dim, eps):
    """One pre-LN ViT encoder layer per grid step.

    Grid is (batch, layer).  The residual stream lives in o_ref, which is VMEM-resident
    across the whole layer axis (its block index only depends on the batch index).
    """
    # Initialize the VMEM-resident residual stream from the embedded input at layer 0.
    @pl.when(pl.program_id(1) == 0)
    def _():
        o_ref[...] = x_ref[...]

    x = o_ref[0]                                    # (S, D) f32 residual stream
    vec = vecd_ref[0]                               # (6, D) packed per-layer vectors
    ln1_g, ln1_b = vec[0:1, :], vec[1:2, :]
    ln2_g, ln2_b = vec[2:3, :], vec[3:4, :]
    bo, b2 = vec[4:5, :], vec[5:6, :]

    s_len, d = x.shape

    # ------------------------- multi-head self attention -------------------------
    mu = jnp.mean(x, axis=-1, keepdims=True)
    xc = x - mu
    var = jnp.mean(xc * xc, axis=-1, keepdims=True)
    xn = xc * lax.rsqrt(var + eps) * ln1_g + ln1_b                       # f32

    # single (S, D) @ (D, 3D) QKV projection; 1/sqrt(head_dim) pre-folded into Q cols
    qkv = (jnp.dot(xn.astype(jnp.bfloat16), wqkv_ref[0],
                   preferred_element_type=jnp.float32) + bqkv_ref[0])    # (S, 3D) f32

    # head-major layout: (S, 3D) -> (3H, S, dh); heads index a leading (non-lane) axis
    qkv_h = jnp.swapaxes(qkv.reshape(s_len, 3 * n_heads, head_dim), 0, 1)
    q = qkv_h[:n_heads]                                                  # (H, S, dh)
    k = qkv_h[n_heads:2 * n_heads]
    v = qkv_h[2 * n_heads:]

    scores = jnp.einsum('hqd,hkd->hqk', q, k,
                        preferred_element_type=jnp.float32)              # (H, S, S)
    p = jnp.exp(scores - jnp.max(scores, axis=-1, keepdims=True))
    p = p * pl.reciprocal(jnp.sum(p, axis=-1, keepdims=True), approx=True)
    ctx = jnp.einsum('hqk,hkd->hqd', p, v,
                     preferred_element_type=jnp.float32)                 # (H, S, dh)

    # concatenate heads and do ONE D-deep output projection (no per-head accumulation)
    ctx = jnp.swapaxes(ctx, 0, 1).reshape(s_len, d)                      # (S, D)
    attn = (jnp.dot(ctx.astype(jnp.bfloat16), wo_ref[0],
                    preferred_element_type=jnp.float32) + bo)
    x = x + attn                                                         # residual 1

    # ------------------------------------ MLP ------------------------------------
    mu2 = jnp.mean(x, axis=-1, keepdims=True)
    xc2 = x - mu2
    var2 = jnp.mean(xc2 * xc2, axis=-1, keepdims=True)
    xn2 = xc2 * lax.rsqrt(var2 + eps) * ln2_g + ln2_b

    h = (jnp.dot(xn2.astype(jnp.bfloat16), w1_ref[0],
                 preferred_element_type=jnp.float32) + b1_ref[0])        # (S, F)
    h = 0.5 * h * (1.0 + lax.erf(h * (1.0 / math.sqrt(2.0))))            # exact GELU, f32
    mlp = (jnp.dot(h.astype(jnp.bfloat16), w2_ref[0],
                   preferred_element_type=jnp.float32) + b2)

    o_ref[0] = x + mlp                                                   # residual 2


def vit_encoder(x_emb, wqkv, bqkv, wo, w1, b1, w2, vecd):
    """Run the whole transformer encoder as one pallas_call with grid (batch, layer)."""
    n, s, d = x_emb.shape
    n_layers, _, d3 = wqkv.shape
    f = w1.shape[2]
    kern = functools.partial(_encoder_kernel, n_heads=N_HEADS, head_dim=HEAD_DIM,
                             eps=LN_EPS)
    return pl.pallas_call(
        kern,
        out_shape=jax.ShapeDtypeStruct((n, s, d), jnp.float32),
        grid=(n, n_layers),
        in_specs=[
            pl.BlockSpec((1, s, d), lambda i, l: (i, 0, 0)),       # embedded input
            pl.BlockSpec((1, d, d3), lambda i, l: (l, 0, 0)),      # wqkv  (L, D, 3D) bf16
            pl.BlockSpec((1, 1, d3), lambda i, l: (l, 0, 0)),      # bqkv  (L, 1, 3D)
            pl.BlockSpec((1, d, d), lambda i, l: (l, 0, 0)),       # wo    (L, D, D) bf16
            pl.BlockSpec((1, d, f), lambda i, l: (l, 0, 0)),       # w1    (L, D, F) bf16
            pl.BlockSpec((1, 1, f), lambda i, l: (l, 0, 0)),       # b1    (L, 1, F)
            pl.BlockSpec((1, f, d), lambda i, l: (l, 0, 0)),       # w2    (L, F, D) bf16
            pl.BlockSpec((1, 6, d), lambda i, l: (l, 0, 0)),       # packed ln/bias vectors
        ],
        # block index constant along the layer axis -> residual stream stays in VMEM,
        # written back to HBM only when the batch index changes.
        out_specs=pl.BlockSpec((1, s, d), lambda i, l: (i, 0, 0)),
        compiler_params=pltpu.CompilerParams(
            dimension_semantics=("parallel", "arbitrary")),
    )(x_emb, wqkv, bqkv, wo, w1, b1, w2, vecd)


# ---------------------------------- parameter init ----------------------------------
def init_params(key):
    keys = iter(jax.random.split(key, 128))

    def nrm(shape, s=0.02):
        return s * jax.random.normal(next(keys), shape, jnp.float32)

    p = {}
    # conv1 (no bias) + BatchNorm2d(C, eps=0.0) buffers/affine (eval mode)
    p["conv1_w"] = nrm((C_CONV, 1, 1, K_W), 0.3)
    p["bn_gamma"] = 1.0 + nrm((C_CONV,), 0.1)
    p["bn_beta"] = nrm((C_CONV,), 0.1)
    p["bn_mean"] = nrm((C_CONV,), 0.2)
    p["bn_var"] = 0.5 + jax.random.uniform(next(keys), (C_CONV,), jnp.float32)

    # ViT embeddings: grouped-conv patch projection, cls token, position embeddings
    p["patch_w"] = nrm((D_EMB, 1, PATCH_H, 1), 0.1)
    p["patch_b"] = nrm((D_EMB,), 0.02)
    p["cls_token"] = nrm((1, 1, D_EMB), 0.02)
    p["pos_emb"] = nrm((1, SEQ, D_EMB), 0.02)

    # transformer layers (weights stored (in, out); QKV pre-concatenated q|k|v; matmul
    # weights stored in bf16, LayerNorm params / biases kept f32)
    p["layers"] = []
    for _ in range(N_LAYERS):
        lyr = {
            "ln1_g": 1.0 + nrm((D_EMB,), 0.05), "ln1_b": nrm((D_EMB,), 0.02),
            "wqkv": nrm((D_EMB, 3 * D_EMB)).astype(jnp.bfloat16),
            "bqkv": nrm((3 * D_EMB,), 0.01),
            "wo": nrm((D_EMB, D_EMB)).astype(jnp.bfloat16),
            "bo": nrm((D_EMB,), 0.01),
            "ln2_g": 1.0 + nrm((D_EMB,), 0.05), "ln2_b": nrm((D_EMB,), 0.02),
            "w1": nrm((D_EMB, D_FF)).astype(jnp.bfloat16), "b1": nrm((D_FF,), 0.01),
            "w2": nrm((D_FF, D_EMB)).astype(jnp.bfloat16), "b2": nrm((D_EMB,), 0.01),
        }
        p["layers"].append(lyr)

    p["lnf_g"] = 1.0 + nrm((D_EMB,), 0.05)
    p["lnf_b"] = nrm((D_EMB,), 0.02)

    # classifier: Linear(D->hidden) -> Dropout -> Linear(hidden->num_classes)
    p["wc1"] = nrm((D_EMB, HIDDEN), 0.05)
    p["bc1"] = nrm((HIDDEN,), 0.01)
    p["wc2"] = nrm((HIDDEN, NUM_CLASSES), 0.05)
    p["bc2"] = nrm((NUM_CLASSES,), 0.01)
    return p


# ------------------------------------- forward --------------------------------------
def eegvit_forward(params, x):
    """x: (N, 1, H, W) float32 (NCHW). Returns logits (N, num_classes)."""
    n = x.shape[0]

    # ---- fold conv1 + eval-mode BN + grouped patch-embedding into one dense matmul ----
    scale = params["bn_gamma"] * lax.rsqrt(params["bn_var"] + BN_EPS)    # (C,)
    shift = params["bn_beta"] - params["bn_mean"] * scale                # (C,)
    mult = D_EMB // C_CONV
    grp = jnp.arange(D_EMB) // mult                                      # out-ch -> in-ch
    wp = params["patch_w"][:, 0, :, 0]                                   # (D, PATCH_H)
    cw = params["conv1_w"][:, 0, 0, :][grp]                              # (D, K_W)
    wf = wp[:, :, None] * cw[:, None, :] * scale[grp][:, None, None]     # (D, PH, KW)
    w_fused = wf.reshape(D_EMB, PATCH_H * K_W).T                         # (PH*KW, D) f32
    b_fused = shift[grp] * jnp.sum(wp, axis=1) + params["patch_b"]       # (D,)
    bias_pos = b_fused[None, :] + params["pos_emb"][0, 1:, :]            # (+ patch pos emb)

    # ---- window extraction (stride == kernel -> pure reshapes) + tiny embedding matmul.
    #      Done in plain XLA per perf review: launch + DMA setup >> ~12K MACs. ----
    xp = jnp.pad(x, ((0, 0), (0, 0), (0, 0), (PAD_W, PAD_W)))[:, 0, :, :OUT_W * K_W]
    x_win = (xp.reshape(n, N_PATCH_H, PATCH_H, OUT_W, K_W)
               .transpose(0, 1, 3, 2, 4)
               .reshape(n, NUM_PATCHES, PATCH_H * K_W))
    emb = x_win @ w_fused + bias_pos[None]                               # (n, P, D)

    cls_row = params["cls_token"][0] + params["pos_emb"][:, 0, :]        # (1, D)
    cls_rows = jnp.broadcast_to(cls_row[None], (n, 1, D_EMB))
    x_seq = jnp.concatenate([cls_rows, emb], axis=1).astype(jnp.float32)  # (n, SEQ, D)
    # TODO(synk): embedding dropout is identity in eval mode.

    # ---- stack per-layer weights with a leading L axis; fold 1/sqrt(head_dim) into Q ----
    qscale = jnp.concatenate([jnp.full((D_EMB,), ATTN_SCALE, jnp.float32),
                              jnp.ones((2 * D_EMB,), jnp.float32)])
    wqkv = jnp.stack([(l["wqkv"].astype(jnp.float32) * qscale[None, :]).astype(jnp.bfloat16)
                      for l in params["layers"]])                        # (L, D, 3D) bf16
    bqkv = jnp.stack([(l["bqkv"] * qscale)[None, :] for l in params["layers"]])  # (L, 1, 3D)
    wo = jnp.stack([l["wo"] for l in params["layers"]])                  # (L, D, D) bf16
    w1 = jnp.stack([l["w1"] for l in params["layers"]])                  # (L, D, F) bf16
    b1 = jnp.stack([l["b1"][None, :] for l in params["layers"]])         # (L, 1, F)
    w2 = jnp.stack([l["w2"] for l in params["layers"]])                  # (L, F, D) bf16
    vecd = jnp.stack([jnp.stack([l["ln1_g"], l["ln1_b"], l["ln2_g"], l["ln2_b"],
                                 l["bo"], l["b2"]]) for l in params["layers"]])  # (L, 6, D)

    # ---- whole transformer encoder: ONE pallas_call, grid = (batch, layer) ----
    x_seq = vit_encoder(x_seq, wqkv, bqkv, wo, w1, b1, w2, vecd)

    # ---- final LayerNorm (per-row -> CLS row only) + classifier head (plain XLA) ----
    cls_tok = x_seq[:, 0, :]
    mu = jnp.mean(cls_tok, axis=-1, keepdims=True)
    xc = cls_tok - mu
    var = jnp.mean(xc * xc, axis=-1, keepdims=True)
    xn = xc * lax.rsqrt(var + LN_EPS) * params["lnf_g"] + params["lnf_b"]
    h1 = xn @ params["wc1"] + params["bc1"]
    # Dropout(p=0.1) is identity in eval mode.
    logits = h1 @ params["wc2"] + params["bc2"]
    return logits


# --------------------------------------- main ---------------------------------------
if __name__ == "__main__":
    key = jax.random.PRNGKey(0)
    k_param, k_x = jax.random.split(key)
    params = init_params(k_param)
    x = jax.random.normal(k_x, (N_BATCH, 1, IN_H, IN_W), jnp.float32)   # NCHW

    logits = jax.jit(eegvit_forward)(params, x)
    logits = jax.block_until_ready(logits)
    assert logits.shape == (N_BATCH, NUM_CLASSES)
    assert bool(jnp.all(jnp.isfinite(logits)))
    print("KERNEL_OK")
</pallas_src>

<mosaic_0001>
module attributes {stable_mosaic.version = 11 : i64} {
  func.func @_encoder_kernel(%arg0: i32, %arg1: i32, %arg2: memref<1x17x32xf32, #tpu.memory_space<vmem>>, %arg3: memref<1x32x96xbf16, #tpu.memory_space<vmem>>, %arg4: memref<1x1x96xf32, #tpu.memory_space<vmem>>, %arg5: memref<1x32x32xbf16, #tpu.memory_space<vmem>>, %arg6: memref<1x32x64xbf16, #tpu.memory_space<vmem>>, %arg7: memref<1x1x64xf32, #tpu.memory_space<vmem>>, %arg8: memref<1x64x32xbf16, #tpu.memory_space<vmem>>, %arg9: memref<1x6x32xf32, #tpu.memory_space<vmem>>, %arg10: memref<1x17x32xf32, #tpu.memory_space<vmem>>) attributes {dimension_semantics = [#tpu.dimension_semantics<parallel>, #tpu.dimension_semantics<arbitrary>], iteration_bounds = array<i64: 2, 2>, scalar_prefetch = 0 : i64, scratch_operands = 0 : i64, tpu.core_type = #tpu.core_type<tc>, window_params = [{transform_indices = @transform_0, window_bounds = array<i64: 1, 17, 32>}, {transform_indices = @transform_1, window_bounds = array<i64: 1, 32, 96>}, {transform_indices = @transform_2, window_bounds = array<i64: 1, 1, 96>}, {transform_indices = @transform_3, window_bounds = array<i64: 1, 32, 32>}, {transform_indices = @transform_4, window_bounds = array<i64: 1, 32, 64>}, {transform_indices = @transform_5, window_bounds = array<i64: 1, 1, 64>}, {transform_indices = @transform_6, window_bounds = array<i64: 1, 64, 32>}, {transform_indices = @transform_7, window_bounds = array<i64: 1, 6, 32>}, {transform_indices = @transform_8, window_bounds = array<i64: 1, 17, 32>}]} {
    %c0_i32 = arith.constant 0 : i32
    %0 = arith.cmpi eq, %arg1, %c0_i32 : i32
    %1 = arith.extui %0 : i1 to i32
    %c0_i32_0 = arith.constant 0 : i32
    %2 = arith.cmpi ne, %1, %c0_i32_0 : i32
    scf.if %2 {
      %c0_47 = arith.constant 0 : index
      %c0_48 = arith.constant 0 : index
      %c0_49 = arith.constant 0 : index
      %113 = vector.load %arg2[%c0_47, %c0_48, %c0_49] : memref<1x17x32xf32, #tpu.memory_space<vmem>>, vector<1x17x32xf32>
      %c0_50 = arith.constant 0 : index
      %c0_51 = arith.constant 0 : index
      %c0_52 = arith.constant 0 : index
      %114 = vector.load %arg10[%c0_50, %c0_51, %c0_52] : memref<1x17x32xf32, #tpu.memory_space<vmem>>, vector<1x17x32xf32>
      tpu.vector_store %arg10[%c0_50, %c0_51, %c0_52], %113 {strides = array<i32>} : memref<1x17x32xf32, #tpu.memory_space<vmem>>, vector<1x17x32xf32>,
    } else {
    }
    %c0 = arith.constant 0 : index
    %c0_1 = arith.constant 0 : index
    %c0_2 = arith.constant 0 : index
    %3 = vector.load %arg10[%c0, %c0_1, %c0_2] : memref<1x17x32xf32, #tpu.memory_space<vmem>>, vector<1x17x32xf32>
    %4 = vector.shape_cast %3 : vector<1x17x32xf32> to vector<17x32xf32>
    %c0_3 = arith.constant 0 : index
    %c0_4 = arith.constant 0 : index
    %c0_5 = arith.constant 0 : index
    %5 = vector.load %arg9[%c0_3, %c0_4, %c0_5] : memref<1x6x32xf32, #tpu.memory_space<vmem>>, vector<1x6x32xf32>
    %6 = vector.shape_cast %5 : vector<1x6x32xf32> to vector<6x32xf32>
    %7 = vector.extract_strided_slice %6 {offsets = [0, 0], sizes = [1, 32], strides = [1, 1]} : vector<6x32xf32> to vector<1x32xf32>
    %8 = vector.extract_strided_slice %6 {offsets = [1, 0], sizes = [1, 32], strides = [1, 1]} : vector<6x32xf32> to vector<1x32xf32>
    %9 = vector.extract_strided_slice %6 {offsets = [2, 0], sizes = [1, 32], strides = [1, 1]} : vector<6x32xf32> to vector<1x32xf32>
    %10 = vector.extract_strided_slice %6 {offsets = [3, 0], sizes = [1, 32], strides = [1, 1]} : vector<6x32xf32> to vector<1x32xf32>
    %11 = vector.extract_strided_slice %6 {offsets = [4, 0], sizes = [1, 32], strides = [1, 1]} : vector<6x32xf32> to vector<1x32xf32>
    %12 = vector.extract_strided_slice %6 {offsets = [5, 0], sizes = [1, 32], strides = [1, 1]} : vector<6x32xf32> to vector<1x32xf32>
    %cst = arith.constant dense<0.000000e+00> : vector<17xf32>
    %13 = vector.multi_reduction <add>, %4, %cst [1] : vector<17x32xf32> to vector<17xf32>
    %14 = vector.shape_cast %13 : vector<17xf32> to vector<17x1xf32>
    %cst_6 = arith.constant 3.200000e+01 : f32
    %15 = vector.broadcast %cst_6 : f32 to vector<17x1xf32>
    %16 = arith.divf %14, %15 : vector<17x1xf32>
    %17 = vector.broadcast %16 : vector<17x1xf32> to vector<17x32xf32>
    %18 = arith.subf %4, %17 : vector<17x32xf32>
    %19 = arith.mulf %18, %18 : vector<17x32xf32>
    %cst_7 = arith.constant dense<0.000000e+00> : vector<17xf32>
    %20 = vector.multi_reduction <add>, %19, %cst_7 [1] : vector<17x32xf32> to vector<17xf32>
    %21 = vector.shape_cast %20 : vector<17xf32> to vector<17x1xf32>
    %cst_8 = arith.constant 3.200000e+01 : f32
    %22 = vector.broadcast %cst_8 : f32 to vector<17x1xf32>
    %23 = arith.divf %21, %22 : vector<17x1xf32>
    %cst_9 = arith.constant 9.99999996E-13 : f32
    %24 = vector.broadcast %cst_9 : f32 to vector<17x1xf32>
    %25 = arith.addf %23, %24 : vector<17x1xf32>
    %26 = math.rsqrt %25 : vector<17x1xf32>
    %27 = vector.broadcast %26 : vector<17x1xf32> to vector<17x32xf32>
    %28 = arith.mulf %18, %27 : vector<17x32xf32>
    %29 = vector.broadcast %7 : vector<1x32xf32> to vector<17x32xf32>
    %30 = arith.mulf %28, %29 : vector<17x32xf32>
    %31 = vector.broadcast %8 : vector<1x32xf32> to vector<17x32xf32>
    %32 = arith.addf %30, %31 : vector<17x32xf32>
    %33 = arith.truncf %32 : vector<17x32xf32> to vector<17x32xbf16>
    %c0_10 = arith.constant 0 : index
    %c0_11 = arith.constant 0 : index
    %c0_12 = arith.constant 0 : index
    %34 = vector.load %arg3[%c0_10, %c0_11, %c0_12] : memref<1x32x96xbf16, #tpu.memory_space<vmem>>, vector<1x32x96xbf16>
    %35 = vector.shape_cast %34 : vector<1x32x96xbf16> to vector<32x96xbf16>
    %cst_13 = arith.constant dense<0.000000e+00> : vector<17x96xf32>
    %36 = tpu.matmul %33, %35, %cst_13 {dimension_numbers = #tpu.dot_dimension_numbers<[1], [0], [0], [1], [0, 0, 1, 1], [], []>} : vector<17x32xbf16>, vector<32x96xbf16>, vector<17x96xf32> -> vector<17x96xf32>
    %c0_14 = arith.constant 0 : index
    %c0_15 = arith.constant 0 : index
    %c0_16 = arith.constant 0 : index
    %37 = vector.load %arg4[%c0_14, %c0_15, %c0_16] : memref<1x1x96xf32, #tpu.memory_space<vmem>>, vector<1x1x96xf32>
    %38 = vector.shape_cast %37 : vector<1x1x96xf32> to vector<1x96xf32>
    %39 = vector.broadcast %38 : vector<1x96xf32> to vector<17x96xf32>
    %40 = arith.addf %36, %39 : vector<17x96xf32>
    %41 = vector.shape_cast %40 : vector<17x96xf32> to vector<17x12x8xf32>
    %42 = tpu.transpose %41, [1, 0, 2] : vector<17x12x8xf32> -> vector<12x17x8xf32>
    %43 = vector.extract_strided_slice %42 {offsets = [0, 0, 0], sizes = [4, 17, 8], strides = [1, 1, 1]} : vector<12x17x8xf32> to vector<4x17x8xf32>
    %44 = vector.extract_strided_slice %42 {offsets = [4, 0, 0], sizes = [4, 17, 8], strides = [1, 1, 1]} : vector<12x17x8xf32> to vector<4x17x8xf32>
    %45 = vector.extract_strided_slice %42 {offsets = [8, 0, 0], sizes = [4, 17, 8], strides = [1, 1, 1]} : vector<12x17x8xf32> to vector<4x17x8xf32>
    "tpu.trace_start"() <{level = 10 : i32, message = "hqd,hkd->hqk"}> : () -> ()
    %cst_17 = arith.constant dense<0.000000e+00> : vector<4x17x17xf32>
    %46 = tpu.matmul %43, %44, %cst_17 {dimension_numbers = #tpu.dot_dimension_numbers<[2], [2], [1], [1], [0, 0, 0, 1, 1, 1], [0], [0]>} : vector<4x17x8xf32>, vector<4x17x8xf32>, vector<4x17x17xf32> -> vector<4x17x17xf32>
    "tpu.trace_stop"() : () -> ()
    %cst_18 = arith.constant dense<0xFF800000> : vector<4x17xf32>
    %47 = vector.multi_reduction <maximumf>, %46, %cst_18 [2] : vector<4x17x17xf32> to vector<4x17xf32>
    %48 = vector.shape_cast %47 : vector<4x17xf32> to vector<4x17x1xf32>
    %49 = vector.broadcast %48 : vector<4x17x1xf32> to vector<4x17x17xf32>
    %50 = arith.subf %46, %49 : vector<4x17x17xf32>
    %51 = math.exp %50 : vector<4x17x17xf32>
    %cst_19 = arith.constant dense<0.000000e+00> : vector<4x17xf32>
    %52 = vector.multi_reduction <add>, %51, %cst_19 [2] : vector<4x17x17xf32> to vector<4x17xf32>
    %53 = vector.shape_cast %52 : vector<4x17xf32> to vector<4x17x1xf32>
    %54 = tpu.reciprocal %53 {approx = true} : vector<4x17x1xf32> -> vector<4x17x1xf32>
    %55 = vector.broadcast %54 : vector<4x17x1xf32> to vector<4x17x17xf32>
    %56 = arith.mulf %51, %55 : vector<4x17x17xf32>
    "tpu.trace_start"() <{level = 10 : i32, message = "hqk,hkd->hqd"}> : () -> ()
    %cst_20 = arith.constant dense<0.000000e+00> : vector<4x17x8xf32>
    %57 = tpu.matmul %56, %45, %cst_20 {dimension_numbers = #tpu.dot_dimension_numbers<[2], [1], [1], [2], [0, 0, 0, 1, 1, 2], [0], [0]>} : vector<4x17x17xf32>, vector<4x17x8xf32>, vector<4x17x8xf32> -> vector<4x17x8xf32>
    "tpu.trace_stop"() : () -> ()
    %58 = tpu.transpose %57, [1, 0, 2] : vector<4x17x8xf32> -> vector<17x4x8xf32>
    %59 = vector.shape_cast %58 : vector<17x4x8xf32> to vector<17x32xf32>
    %60 = arith.truncf %59 : vector<17x32xf32> to vector<17x32xbf16>
    %c0_21 = arith.constant 0 : index
    %c0_22 = arith.constant 0 : index
    %c0_23 = arith.constant 0 : index
    %61 = vector.load %arg5[%c0_21, %c0_22, %c0_23] : memref<1x32x32xbf16, #tpu.memory_space<vmem>>, vector<1x32x32xbf16>
    %62 = vector.shape_cast %61 : vector<1x32x32xbf16> to vector<32x32xbf16>
    %cst_24 = arith.constant dense<0.000000e+00> : vector<17x32xf32>
    %63 = tpu.matmul %60, %62, %cst_24 {dimension_numbers = #tpu.dot_dimension_numbers<[1], [0], [0], [1], [0, 0, 1, 1], [], []>} : vector<17x32xbf16>, vector<32x32xbf16>, vector<17x32xf32> -> vector<17x32xf32>
    %64 = vector.broadcast %11 : vector<1x32xf32> to vector<17x32xf32>
    %65 = arith.addf %63, %64 : vector<17x32xf32>
    %66 = arith.addf %4, %65 : vector<17x32xf32>
    %cst_25 = arith.constant dense<0.000000e+00> : vector<17xf32>
    %67 = vector.multi_reduction <add>, %66, %cst_25 [1] : vector<17x32xf32> to vector<17xf32>
    %68 = vector.shape_cast %67 : vector<17xf32> to vector<17x1xf32>
    %cst_26 = arith.constant 3.200000e+01 : f32
    %69 = vector.broadcast %cst_26 : f32 to vector<17x1xf32>
    %70 = arith.divf %68, %69 : vector<17x1xf32>
    %71 = vector.broadcast %70 : vector<17x1xf32> to vector<17x32xf32>
    %72 = arith.subf %66, %71 : vector<17x32xf32>
    %73 = arith.mulf %72, %72 : vector<17x32xf32>
    %cst_27 = arith.constant dense<0.000000e+00> : vector<17xf32>
    %74 = vector.multi_reduction <add>, %73, %cst_27 [1] : vector<17x32xf32> to vector<17xf32>
    %75 = vector.shape_cast %74 : vector<17xf32> to vector<17x1xf32>
    %cst_28 = arith.constant 3.200000e+01 : f32
    %76 = vector.broadcast %cst_28 : f32 to vector<17x1xf32>
    %77 = arith.divf %75, %76 : vector<17x1xf32>
    %cst_29 = arith.constant 9.99999996E-13 : f32
    %78 = vector.broadcast %cst_29 : f32 to vector<17x1xf32>
    %79 = arith.addf %77, %78 : vector<17x1xf32>
    %80 = math.rsqrt %79 : vector<17x1xf32>
    %81 = vector.broadcast %80 : vector<17x1xf32> to vector<17x32xf32>
    %82 = arith.mulf %72, %81 : vector<17x32xf32>
    %83 = vector.broadcast %9 : vector<1x32xf32> to vector<17x32xf32>
    %84 = arith.mulf %82, %83 : vector<17x32xf32>
    %85 = vector.broadcast %10 : vector<1x32xf32> to vector<17x32xf32>
    %86 = arith.addf %84, %85 : vector<17x32xf32>
    %87 = arith.truncf %86 : vector<17x32xf32> to vector<17x32xbf16>
    %c0_30 = arith.constant 0 : index
    %c0_31 = arith.constant 0 : index
    %c0_32 = arith.constant 0 : index
    %88 = vector.load %arg6[%c0_30, %c0_31, %c0_32] : memref<1x32x64xbf16, #tpu.memory_space<vmem>>, vector<1x32x64xbf16>
    %89 = vector.shape_cast %88 : vector<1x32x64xbf16> to vector<32x64xbf16>
    %cst_33 = arith.constant dense<0.000000e+00> : vector<17x64xf32>
    %90 = tpu.matmul %87, %89, %cst_33 {dimension_numbers = #tpu.dot_dimension_numbers<[1], [0], [0], [1], [0, 0, 1, 1], [], []>} : vector<17x32xbf16>, vector<32x64xbf16>, vector<17x64xf32> -> vector<17x64xf32>
    %c0_34 = arith.constant 0 : index
    %c0_35 = arith.constant 0 : index
    %c0_36 = arith.constant 0 : index
    %91 = vector.load %arg7[%c0_34, %c0_35, %c0_36] : memref<1x1x64xf32, #tpu.memory_space<vmem>>, vector<1x1x64xf32>
    %92 = vector.shape_cast %91 : vector<1x1x64xf32> to vector<1x64xf32>
    %93 = vector.broadcast %92 : vector<1x64xf32> to vector<17x64xf32>
    %94 = arith.addf %90, %93 : vector<17x64xf32>
    %cst_37 = arith.constant 5.000000e-01 : f32
    %95 = vector.broadcast %cst_37 : f32 to vector<17x64xf32>
    %96 = arith.mulf %95, %94 : vector<17x64xf32>
    %cst_38 = arith.constant 0.707106769 : f32
    %97 = vector.broadcast %cst_38 : f32 to vector<17x64xf32>
    %98 = arith.mulf %94, %97 : vector<17x64xf32>
    %99 = math.erf %98 : vector<17x64xf32>
    %cst_39 = arith.constant 1.000000e+00 : f32
    %100 = vector.broadcast %cst_39 : f32 to vector<17x64xf32>
    %101 = arith.addf %100, %99 : vector<17x64xf32>
    %102 = arith.mulf %96, %101 : vector<17x64xf32>
    %103 = arith.truncf %102 : vector<17x64xf32> to vector<17x64xbf16>
    %c0_40 = arith.constant 0 : index
    %c0_41 = arith.constant 0 : index
    %c0_42 = arith.constant 0 : index
    %104 = vector.load %arg8[%c0_40, %c0_41, %c0_42] : memref<1x64x32xbf16, #tpu.memory_space<vmem>>, vector<1x64x32xbf16>
    %105 = vector.shape_cast %104 : vector<1x64x32xbf16> to vector<64x32xbf16>
    %cst_43 = arith.constant dense<0.000000e+00> : vector<17x32xf32>
    %106 = tpu.matmul %103, %105, %cst_43 {dimension_numbers = #tpu.dot_dimension_numbers<[1], [0], [0], [1], [0, 0, 1, 1], [], []>} : vector<17x64xbf16>, vector<64x32xbf16>, vector<17x32xf32> -> vector<17x32xf32>
    %107 = vector.broadcast %12 : vector<1x32xf32> to vector<17x32xf32>
    %108 = arith.addf %106, %107 : vector<17x32xf32>
    %109 = arith.addf %66, %108 : vector<17x32xf32>
    %c0_44 = arith.constant 0 : index
    %c0_45 = arith.constant 0 : index
    %c0_46 = arith.constant 0 : index
    %110 = vector.load %arg10[%c0_44, %c0_45, %c0_46] : memref<1x17x32xf32, #tpu.memory_space<vmem>>, vector<1x17x32xf32>
    %111 = vector.shape_cast %110 : vector<1x17x32xf32> to vector<17x32xf32>
    %112 = vector.shape_cast %109 : vector<17x32xf32> to vector<1x17x32xf32>
    tpu.vector_store %arg10[%c0_44, %c0_45, %c0_46], %112 {strides = array<i32>} : memref<1x17x32xf32, #tpu.memory_space<vmem>>, vector<1x17x32xf32>,
    return
  }
  func.func @transform_0(%arg0: i32, %arg1: i32) -> (i32, i32, i32) {
    %c0_i32 = arith.constant 0 : i32
    %c0_i32_0 = arith.constant 0 : i32
    %c0_i32_1 = arith.constant 0 : i32
    return %arg0, %c0_i32, %c0_i32_0 : i32, i32, i32
  }
  func.func @transform_1(%arg0: i32, %arg1: i32) -> (i32, i32, i32) {
    %c0_i32 = arith.constant 0 : i32
    %c0_i32_0 = arith.constant 0 : i32
    %c0_i32_1 = arith.constant 0 : i32
    return %arg1, %c0_i32, %c0_i32_0 : i32, i32, i32
  }
  func.func @transform_2(%arg0: i32, %arg1: i32) -> (i32, i32, i32) {
    %c0_i32 = arith.constant 0 : i32
    %c0_i32_0 = arith.constant 0 : i32
    %c0_i32_1 = arith.constant 0 : i32
    return %arg1, %c0_i32, %c0_i32_0 : i32, i32, i32
  }
  func.func @transform_3(%arg0: i32, %arg1: i32) -> (i32, i32, i32) {
    %c0_i32 = arith.constant 0 : i32
    %c0_i32_0 = arith.constant 0 : i32
    %c0_i32_1 = arith.constant 0 : i32
    return %arg1, %c0_i32, %c0_i32_0 : i32, i32, i32
  }
  func.func @transform_4(%arg0: i32, %arg1: i32) -> (i32, i32, i32) {
    %c0_i32 = arith.constant 0 : i32
    %c0_i32_0 = arith.constant 0 : i32
    %c0_i32_1 = arith.constant 0 : i32
    return %arg1, %c0_i32, %c0_i32_0 : i32, i32, i32
  }
  func.func @transform_5(%arg0: i32, %arg1: i32) -> (i32, i32, i32) {
    %c0_i32 = arith.constant 0 : i32
    %c0_i32_0 = arith.constant 0 : i32
    %c0_i32_1 = arith.constant 0 : i32
    return %arg1, %c0_i32, %c0_i32_0 : i32, i32, i32
  }
  func.func @transform_6(%arg0: i32, %arg1: i32) -> (i32, i32, i32) {
    %c0_i32 = arith.constant 0 : i32
    %c0_i32_0 = arith.constant 0 : i32
    %c0_i32_1 = arith.constant 0 : i32
    return %arg1, %c0_i32, %c0_i32_0 : i32, i32, i32
  }
  func.func @transform_7(%arg0: i32, %arg1: i32) -> (i32, i32, i32) {
    %c0_i32 = arith.constant 0 : i32
    %c0_i32_0 = arith.constant 0 : i32
    %c0_i32_1 = arith.constant 0 : i32
    return %arg1, %c0_i32, %c0_i32_0 : i32, i32, i32
  }
  func.func @transform_8(%arg0: i32, %arg1: i32) -> (i32, i32, i32) {
    %c0_i32 = arith.constant 0 : i32
    %c0_i32_0 = arith.constant 0 : i32
    %c0_i32_1 = arith.constant 0 : i32
    return %arg0, %c0_i32, %c0_i32_0 : i32, i32, i32
  }
}

</mosaic_0001>

<bundles_post_ra>
// kernel: squeeze.12
= control target key start
LH: loop header
LB: loop body
LE: loop exit
PB: predicated region body
PF: predicated region fallthrough
CT: control target
= control target key end

     0   :  { %vm66_vm0 = vcmask 48128   ;;  %s529_s10 = smov 122   ;;  %s530_s11 = smov 110   ;;  %v531_v29 = vmov 0.0   ;;  %s708_s0 = inlined_call_operand.vmem [shape: bf16[2,1,16,24], index: 0, kind: input, shape index: {}]   ;;  %s709_s1 = inlined_call_operand.vmem [shape: bf16[2,4,4,4,6], index: 1, kind: output, shape index: {}]  }
   0x1   :  { %v490_v0 = vld [vmem:[%s708_s0] sm:$0xff]   ;;  %v493_v1 = vld [vmem:[%s708_s0 + $0x8] sm:$0xff]   ;;  %s528_s0 = smov 116  }
   0x2   :  { %v491_v2 = vunpack.c.l.bf16 %v490_v0  ;;  %v492_v3 = vunpack.c.h.bf16 %v490_v0  ;;  %v487_v4 = vunpack.c.l.bf16 %v493_v1  ;;  %v488_v5 = vunpack.c.h.bf16 %v493_v1 }
   0x4   :  { %v508_v6 = vpack.i.bf16 %v492_v3, %v491_v2  ;;  %73 = vst.msk [vmem:[#allocation0 + $0x40] ss:$8 sm:$0xf] %vm66_vm0, %v492_v3   ;;  %75 = vst.msk [vmem:[#allocation0 + $0x40] ss:$8 sm:$0xf0] %vm66_vm0, %v492_v3   ;;  %v513_v7 = vpack.i.bf16 %v488_v5, %v487_v4 }
   0x5   :  { %67 = vst.msk [vmem:[#allocation0] ss:$8 sm:$0xf] %vm66_vm0, %v491_v2   ;;  %68 = vst.msk [vmem:[#allocation0] ss:$8 sm:$0xf0] %vm66_vm0, %v491_v2  }
   0x6   :  { %87 = vst.msk [vmem:[#allocation0 + $0xc0] ss:$8 sm:$0xf] %vm66_vm0, %v488_v5   ;;  %89 = vst.msk [vmem:[#allocation0 + $0xc0] ss:$8 sm:$0xf0] %vm66_vm0, %v488_v5   ;;  %509 = vrot.lane.b32.xlu1 %v508_v6, %s528_s0  ;;  %499 = vrot.lane.b32.xlu0 %v508_v6, %s529_s10 }
   0x7   :  { %80 = vst.msk [vmem:[#allocation0 + $0x80] ss:$8 sm:$0xf] %vm66_vm0, %v487_v4   ;;  %82 = vst.msk [vmem:[#allocation0 + $0x80] ss:$8 sm:$0xf0] %vm66_vm0, %v487_v4  }
   0xa   :  { %514 = vrot.lane.b32.xlu1 %v513_v7, %s528_s0  ;;  %504 = vrot.lane.b32.xlu0 %v513_v7, %s529_s10 }
   0xe   :  { %524 = vrot.lane.b32.xlu1 %v513_v7, %s530_s11  ;;  %519 = vrot.lane.b32.xlu0 %v508_v6, %s530_s11 }
  0x78   :  { %v510_v8 = vpop.permute.xlu1 %509  ;;  %v500_v9 = vpop.permute.xlu0 %499 }
  0x79   :  { %v512_v10 = vunpack.i.h.bf16 %v510_v8  ;;  %v511_v11 = vunpack.i.l.bf16 %v510_v8  ;;  %v502_v12 = vunpack.i.h.bf16 %v500_v9  ;;  %v501_v13 = vunpack.i.l.bf16 %v500_v9 }
  0x7b   :  { %139 = vst.msk [vmem:[#allocation0 + $0x42] ss:$8 sm:$0xf] %vm66_vm0, %v512_v10   ;;  %141 = vst.msk [vmem:[#allocation0 + $0x42] ss:$8 sm:$0xf0] %vm66_vm0, %v512_v10  }
  0x7c   :  { %130 = vst.msk [vmem:[#allocation0 + $0x2] ss:$8 sm:$0xf] %vm66_vm0, %v511_v11   ;;  %132 = vst.msk [vmem:[#allocation0 + $0x2] ss:$8 sm:$0xf0] %vm66_vm0, %v511_v11   ;;  %v515_v14 = vpop.permute.xlu1 %514  ;;  %v505_v15 = vpop.permute.xlu0 %504 }
  0x7d   :  { %104 = vst.msk [vmem:[#allocation0 + $0x41] ss:$8 sm:$0xf] %vm66_vm0, %v502_v12   ;;  %106 = vst.msk [vmem:[#allocation0 + $0x41] ss:$8 sm:$0xf0] %vm66_vm0, %v502_v12   ;;  %v517_v16 = vunpack.i.h.bf16 %v515_v14  ;;  %v516_v17 = vunpack.i.l.bf16 %v515_v14  ;;  %v507_v18 = vunpack.i.h.bf16 %v505_v15  ;;  %v506_v19 = vunpack.i.l.bf16 %v505_v15 }
  0x7e   :  { %95 = vst.msk [vmem:[#allocation0 + $0x1] ss:$8 sm:$0xf] %vm66_vm0, %v501_v13   ;;  %97 = vst.msk [vmem:[#allocation0 + $0x1] ss:$8 sm:$0xf0] %vm66_vm0, %v501_v13  }
  0x7f   :  { %157 = vst.msk [vmem:[#allocation0 + $0xc2] ss:$8 sm:$0xf] %vm66_vm0, %v517_v16   ;;  %159 = vst.msk [vmem:[#allocation0 + $0xc2] ss:$8 sm:$0xf0] %vm66_vm0, %v517_v16  }
  0x80   :  { %148 = vst.msk [vmem:[#allocation0 + $0x82] ss:$8 sm:$0xf] %vm66_vm0, %v516_v17   ;;  %150 = vst.msk [vmem:[#allocation0 + $0x82] ss:$8 sm:$0xf0] %vm66_vm0, %v516_v17   ;;  %v525_v20 = vpop.permute.xlu1 %524  ;;  %v520_v21 = vpop.permute.xlu0 %519 }
  0x81   :  { %122 = vst.msk [vmem:[#allocation0 + $0xc1] ss:$8 sm:$0xf] %vm66_vm0, %v507_v18   ;;  %124 = vst.msk [vmem:[#allocation0 + $0xc1] ss:$8 sm:$0xf0] %vm66_vm0, %v507_v18   ;;  %v527_v22 = vunpack.i.h.bf16 %v525_v20  ;;  %v526_v23 = vunpack.i.l.bf16 %v525_v20  ;;  %v522_v24 = vunpack.i.h.bf16 %v520_v21  ;;  %v521_v25 = vunpack.i.l.bf16 %v520_v21 }
  0x82   :  { %113 = vst.msk [vmem:[#allocation0 + $0x81] ss:$8 sm:$0xf] %vm66_vm0, %v506_v19   ;;  %115 = vst.msk [vmem:[#allocation0 + $0x81] ss:$8 sm:$0xf0] %vm66_vm0, %v506_v19  }
  0x83   :  { %192 = vst.msk [vmem:[#allocation0 + $0xc3] ss:$8 sm:$0xf] %vm66_vm0, %v527_v22   ;;  %194 = vst.msk [vmem:[#allocation0 + $0xc3] ss:$8 sm:$0xf0] %vm66_vm0, %v527_v22  }
  0x84   :  { %183 = vst.msk [vmem:[#allocation0 + $0x83] ss:$8 sm:$0xf] %vm66_vm0, %v526_v23   ;;  %185 = vst.msk [vmem:[#allocation0 + $0x83] ss:$8 sm:$0xf0] %vm66_vm0, %v526_v23  }
  0x85   :  { %174 = vst.msk [vmem:[#allocation0 + $0x43] ss:$8 sm:$0xf] %vm66_vm0, %v522_v24   ;;  %176 = vst.msk [vmem:[#allocation0 + $0x43] ss:$8 sm:$0xf0] %vm66_vm0, %v522_v24  }
  0x86   :  { %165 = vst.msk [vmem:[#allocation0 + $0x3] ss:$8 sm:$0xf] %vm66_vm0, %v521_v25   ;;  %167 = vst.msk [vmem:[#allocation0 + $0x3] ss:$8 sm:$0xf0] %vm66_vm0, %v521_v25  }
  0x8a   :  { %v364_v41 = vld [vmem:[#allocation0 + $0xc0] sm:$0xf]  ;;  %v371_v45 = vld [vmem:[#allocation0 + $0xc8] sm:$0xf]  ;;  %v378_v46 = vld [vmem:[#allocation0 + $0xd0] sm:$0xf] }
  0x8b   :  { %v308_v26 = vld [vmem:[#allocation0 + $0x80] sm:$0xf]  ;;  %v315_v27 = vld [vmem:[#allocation0 + $0x88] sm:$0xf]  ;;  %v322_v28 = vld [vmem:[#allocation0 + $0x90] sm:$0xf]  ;;  %v365_v44 = vpack.c.bf16 %v531_v29, %v364_v41  ;;  %v372_v48 = vpack.c.bf16 %v531_v29, %v371_v45  ;;  %v379_v49 = vpack.c.bf16 %v531_v29, %v378_v46 }
  0x8c   :  { %v309_v30 = vpack.c.bf16 %v531_v29, %v308_v26  ;;  %v316_v31 = vpack.c.bf16 %v531_v29, %v315_v27  ;;  %v323_v32 = vpack.c.bf16 %v531_v29, %v322_v28  ;;  %v329_v33 = vld [vmem:[#allocation0 + $0x98] sm:$0xf]  ;;  %v336_v34 = vld [vmem:[#allocation0 + $0xa0] sm:$0xf]  ;;  %v343_v35 = vld [vmem:[#allocation0 + $0xa8] sm:$0xf] }
  0x8d   :  { %v330_v36 = vpack.c.bf16 %v531_v29, %v329_v33  ;;  %v337_v37 = vpack.c.bf16 %v531_v29, %v336_v34  ;;  %v344_v38 = vpack.c.bf16 %v531_v29, %v343_v35  ;;  %v350_v39 = vld [vmem:[#allocation0 + $0xb0] sm:$0xf]  ;;  %v357_v40 = vld [vmem:[#allocation0 + $0xb8] sm:$0xf]  ;;  %v392_v51 = vld [vmem:[#allocation0 + $0xe0] sm:$0xf] }
  0x8e   :  { %469 = vst [vmem:[%s709_s1 + $0x20] sm:$0x3] %v309_v30  ;;  %470 = vst [vmem:[%s709_s1 + $0x22] sm:$0x3] %v316_v31  ;;  %v351_v42 = vpack.c.bf16 %v531_v29, %v350_v39  ;;  %v358_v43 = vpack.c.bf16 %v531_v29, %v357_v40  ;;  %v385_v47 = vld [vmem:[#allocation0 + $0xd8] sm:$0xf]  ;;  %v393_v54 = vpack.c.bf16 %v531_v29, %v392_v51 }
  0x8f   :  { %471 = vst [vmem:[%s709_s1 + $0x24] sm:$0x3] %v323_v32  ;;  %472 = vst [vmem:[%s709_s1 + $0x26] sm:$0x3] %v330_v36  ;;  %v386_v50 = vpack.c.bf16 %v531_v29, %v385_v47  ;;  %v399_v52 = vld [vmem:[#allocation0 + $0xe8] sm:$0xf] }
  0x90   :  { %473 = vst [vmem:[%s709_s1 + $0x28] sm:$0x3] %v337_v37  ;;  %474 = vst [vmem:[%s709_s1 + $0x2a] sm:$0x3] %v344_v38  ;;  %v406_v53 = vld [vmem:[#allocation0 + $0xf0] sm:$0xf]  ;;  %v400_v55 = vpack.c.bf16 %v531_v29, %v399_v52 }
  0x91   :  { %475 = vst [vmem:[%s709_s1 + $0x2c] sm:$0x3] %v351_v42  ;;  %476 = vst [vmem:[%s709_s1 + $0x2e] sm:$0x3] %v358_v43  ;;  %v407_v56 = vpack.c.bf16 %v531_v29, %v406_v53  ;;  %v413_v57 = vld [vmem:[#allocation0 + $0xf8] sm:$0xf] }
  0x92   :  { %477 = vst [vmem:[%s709_s1 + $0x30] sm:$0x3] %v365_v44  ;;  %v252_v58 = vld [vmem:[#allocation0 + $0x40] sm:$0xf]  ;;  %v259_v59 = vld [vmem:[#allocation0 + $0x48] sm:$0xf]  ;;  %v414_v60 = vpack.c.bf16 %v531_v29, %v413_v57 }
  0x93   :  { %478 = vst [vmem:[%s709_s1 + $0x32] sm:$0x3] %v372_v48  ;;  %479 = vst [vmem:[%s709_s1 + $0x34] sm:$0x3] %v379_v49  ;;  %v253_v61 = vpack.c.bf16 %v531_v29, %v252_v58  ;;  %v260_v62 = vpack.c.bf16 %v531_v29, %v259_v59  ;;  %v266_v63 = vld [vmem:[#allocation0 + $0x50] sm:$0xf] }
  0x94   :  { %480 = vst [vmem:[%s709_s1 + $0x36] sm:$0x3] %v386_v50  ;;  %v273_v0 = vld [vmem:[#allocation0 + $0x58] sm:$0xf]  ;;  %v280_v1 = vld [vmem:[#allocation0 + $0x60] sm:$0xf]  ;;  %v267_v2 = vpack.c.bf16 %v531_v29, %v266_v63 }
  0x95   :  { %481 = vst [vmem:[%s709_s1 + $0x38] sm:$0x3] %v393_v54  ;;  %482 = vst [vmem:[%s709_s1 + $0x3a] sm:$0x3] %v400_v55  ;;  %v274_v3 = vpack.c.bf16 %v531_v29, %v273_v0  ;;  %v281_v4 = vpack.c.bf16 %v531_v29, %v280_v1  ;;  %v287_v5 = vld [vmem:[#allocation0 + $0x68] sm:$0xf] }
  0x96   :  { %483 = vst [vmem:[%s709_s1 + $0x3c] sm:$0x3] %v407_v56  ;;  %v294_v6 = vld [vmem:[#allocation0 + $0x70] sm:$0xf]  ;;  %v301_v7 = vld [vmem:[#allocation0 + $0x78] sm:$0xf]  ;;  %v288_v8 = vpack.c.bf16 %v531_v29, %v287_v5 }
  0x97   :  { %484 = vst [vmem:[%s709_s1 + $0x3e] sm:$0x3] %v414_v60  ;;  %461 = vst [vmem:[%s709_s1 + $0x10] sm:$0x3] %v253_v61  ;;  %v295_v9 = vpack.c.bf16 %v531_v29, %v294_v6  ;;  %v302_v10 = vpack.c.bf16 %v531_v29, %v301_v7  ;;  %v199_v11 = vld [vmem:[#allocation0] sm:$0xf] }
  0x98   :  { %462 = vst [vmem:[%s709_s1 + $0x12] sm:$0x3] %v260_v62  ;;  %v204_v12 = vld [vmem:[#allocation0 + $0x8] sm:$0xf]  ;;  %v210_v13 = vld [vmem:[#allocation0 + $0x10] sm:$0xf]  ;;  %v200_v14 = vpack.c.bf16 %v531_v29, %v199_v11 }
  0x99   :  { %463 = vst [vmem:[%s709_s1 + $0x14] sm:$0x3] %v267_v2  ;;  %464 = vst [vmem:[%s709_s1 + $0x16] sm:$0x3] %v274_v3  ;;  %v205_v15 = vpack.c.bf16 %v531_v29, %v204_v12  ;;  %v211_v16 = vpack.c.bf16 %v531_v29, %v210_v13  ;;  %v217_v17 = vld [vmem:[#allocation0 + $0x18] sm:$0xf] }
  0x9a   :  { %465 = vst [vmem:[%s709_s1 + $0x18] sm:$0x3] %v281_v4  ;;  %v224_v18 = vld [vmem:[#allocation0 + $0x20] sm:$0xf]  ;;  %v231_v19 = vld [vmem:[#allocation0 + $0x28] sm:$0xf]  ;;  %v218_v20 = vpack.c.bf16 %v531_v29, %v217_v17 }
  0x9b   :  { %466 = vst [vmem:[%s709_s1 + $0x1a] sm:$0x3] %v288_v8  ;;  %467 = vst [vmem:[%s709_s1 + $0x1c] sm:$0x3] %v295_v9  ;;  %v225_v21 = vpack.c.bf16 %v531_v29, %v224_v18  ;;  %v232_v22 = vpack.c.bf16 %v531_v29, %v231_v19  ;;  %v238_v23 = vld [vmem:[#allocation0 + $0x30] sm:$0xf] }
  0x9c   :  { %468 = vst [vmem:[%s709_s1 + $0x1e] sm:$0x3] %v302_v10  ;;  %v245_v24 = vld [vmem:[#allocation0 + $0x38] sm:$0xf]  ;;  %202 = vst [vmem:[%s709_s1] sm:$0x3] %v200_v14  ;;  %v239_v25 = vpack.c.bf16 %v531_v29, %v238_v23 }
  0x9d   :  { %454 = vst [vmem:[%s709_s1 + $0x2] sm:$0x3] %v205_v15  ;;  %455 = vst [vmem:[%s709_s1 + $0x4] sm:$0x3] %v211_v16  ;;  %v246_v26 = vpack.c.bf16 %v531_v29, %v245_v24 }
  0x9e   :  { %456 = vst [vmem:[%s709_s1 + $0x6] sm:$0x3] %v218_v20  ;;  %457 = vst [vmem:[%s709_s1 + $0x8] sm:$0x3] %v225_v21 }
  0x9f   :  { %458 = vst [vmem:[%s709_s1 + $0xa] sm:$0x3] %v232_v22  ;;  %459 = vst [vmem:[%s709_s1 + $0xc] sm:$0x3] %v239_v25 }
  0xa0   :  { %460 = vst [vmem:[%s709_s1 + $0xe] sm:$0x3] %v246_v26 }

// kernel: eegvit_forward.1
= control target key start
LH: loop header
LB: loop body
LE: loop exit
PB: predicated region body
PF: predicated region fallthrough
CT: control target
= control target key end

     0   :  { %s4011_s27 = smov 0   ;;  %s4013_s28 = smov 0   ;;  %s4730_s0 = inlined_call_operand.vmem [shape: f32[2,17,32], index: 0, kind: input, shape index: {}]   ;;  %s4731_s1 = inlined_call_operand.vmem [shape: bf16[2,32,96], index: 1, kind: input, shape index: {}]   ;;  %s4732_s2 = inlined_call_operand.vmem [shape: f32[2,1,96], index: 2, kind: input, shape index: {}]   ;;  %s4733_s3 = inlined_call_operand.vmem [shape: bf16[2,32,32], index: 3, kind: input, shape index: {}]   ;;  %s4734_s4 = inlined_call_operand.vmem [shape: bf16[2,32,64], index: 4, kind: input, shape index: {}]   ;;  %s4735_s5 = inlined_call_operand.vmem [shape: f32[2,1,64], index: 5, kind: input, shape index: {}]   ;;  %s4736_s6 = inlined_call_operand.vmem [shape: bf16[2,64,32], index: 6, kind: input, shape index: {}]   ;;  %s4737_s7 = inlined_call_operand.vmem [shape: f32[2,6,32], index: 7, kind: input, shape index: {}]   ;;  %s4738_s8 = inlined_call_operand.vmem [shape: f32[2,17,32], index: 8, kind: output, shape index: {}]  }
   0x1   :  { %4739 = sst [smem:[#allocation4_spill]] %s4730_s0  ;;  %s4015_s29 = smov 0  }
   0x2   :  { %4740 = sst [smem:[#allocation5_spill]] %s4731_s1  ;;  %s4017_s30 = smov 0  }
   0x3   :  { %4741 = sst [smem:[#allocation6_spill]] %s4733_s3  ;;  %s4019_s9 = smov 0  }
   0x4 LB: > { %s27_s10 = sadd.s32 1, %s3937_s29  ;;  %s30_s11 = sadd.s32 1, %s3941_s30  ;;  %s3945_s9 = sphi %s4019_s9, %s18_s9   ;;  %s3941_s30 = sphi %s4017_s30, %s4755_s30   ;;  %s3937_s29 = sphi %s4015_s29, %s4754_s29   ;;  %s3933_s28 = sphi %s4013_s28, %s4753_s28   ;;  %s3929_s27 = sphi %s4011_s27, %s4752_s27  }
   0x5   : > { %p28_p0 = scmp.ge.s32.totalorder %s27_s10, 2  ;;  %p3395_p1 = scmp.ge.s32.totalorder %s3945_s9, 1 }
   0x6   : > { %p339_p2 = scmp.lt.s32.totalorder %s3945_s9, 5 }
   0x7   : > { %s4757_s10 = smov (%p28_p0, %s27_s10), 0  ;;  %s4759_s11 = smov (!%p28_p0, %s30_s11), %s3941_s30 }
   0x8   : > { %4742 = sst [smem:[#allocation2_spill]] %s4757_s10  ;;  %p340_p3 = pnand %p3395_p1, %p339_p2 }
   0x9   : > { %p32_p4 = scmp.ge.s32.totalorder %s4759_s11, 2  ;;  %p403_p5 = scmp.lt.s32.totalorder (!%p340_p3), %s3933_s28, 1 }
   0xa   : > { %343 = sbr.rel (%p340_p3) target bundleno = 2690 (0xa82), region = 52  ;;  %p408_p6 = scmp.lt.s32.totalorder (!%p340_p3), %s3929_s27, 1 }
   0xb   : > { %s4761_s11 = smov (%p32_p4, %s4759_s11), 0  ;;  %s4744_s0 = sld [smem:[#allocation4_spill]] (!%p340_p3) }
   0xc   : > { %4743 = sst [smem:[#allocation3_spill]] %s4761_s11  ;;  %s4745_s1 = sld [smem:[#allocation5_spill]] (!%p340_p3) }
   0xd   : > { %s4746_s3 = sld [smem:[#allocation6_spill]] (!%p340_p3)  ;;  %p3407_p7 = scmp.ne.s32.totalorder (!%p340_p3), %s3929_s27, 0 }
  0x11   : > { %s4763_s28 = smov (!%p403_p5, %s3933_s28), 1  ;;  %vm451_vm0 = vcmask (!%p3407_p7), 261120   ;;  %vm454_vm1 = vcmask (!%p3407_p7), 253952  }
  0x12   : > { %s4045_s12 = scalar_select %p408_p6, %s3929_s27, 1 }
  0x13   : > { %s3752_s13 = smul.u32 24, %s4763_s28 }
  0x14   : > { %s3494_s14 = sshll.u32 %s4045_s12, 4  ;;  %s428_s18 = scalar_lea.vmem %s4735_s5, %s4045_s12 }
  0x15   : > { %s407_s20 = scalar_lea.vmem %s4744_s0, %s3752_s13  ;;  %s4058_s23 = scalar_lea.vmem %s4745_s1, %s3494_s14 }
  0x16   : > { %s4063_s26 = scalar_lea.vmem %s4746_s3, %s3494_s14  ;;  %s4068_s10 = scalar_lea.vmem %s4734_s4, %s3494_s14  ;;  %v448_v0 = vld [vmem:[%s407_s20] sm:$0xff] (!%p3407_p7)  ;;  %v449_v1 = vld [vmem:[%s407_s20 + $0x8] sm:$0xff] (!%p3407_p7)  ;;  %v450_v2 = vld [vmem:[%s407_s20 + $0x10] sm:$0x1] (!%p3407_p7) }
  0x17   : > { %s3497_s19 = sshll.u32 %s4045_s12, 5  ;;  %s3405_s22 = sshll.u32 %s4045_s12, 3 }
  0x18   : > { %s4078_s21 = scalar_lea.vmem %s4736_s6, %s3497_s19  ;;  %s4084_s25 = scalar_lea.vmem %s4737_s7, %s3405_s22 }
  0x19   : > { %s4089_s14 = scalar_lea.vmem %s4738_s8, %s3752_s13  ;;  %447 = sbr.rel (%p3407_p7) target bundleno = 32 (0x20), region = 56 }
  0x1a   : > { %452 = vst.msk [vmem:[%s4089_s14] sm:$0xff] (!%p3407_p7), %vm451_vm0, %v448_v0  ;;  %453 = vst.msk [vmem:[%s4089_s14 + $0x8] sm:$0xff] (!%p3407_p7), %vm451_vm0, %v449_v1 }
  0x1b   : > { %455 = vst.msk [vmem:[%s4089_s14 + $0x10] sm:$0x1] (!%p3407_p7), %vm454_vm1, %v450_v2 }
  0x20 PF: > { %vm460_vm2 = vcmask 261120   ;;  %vm467_vm3 = vcmask 253952   ;;  %v3827_v24 = vld [vmem:[%s4058_s23] sm:$0xff]   ;;  %v3828_v25 = vld [vmem:[%s4058_s23 + $0x8] sm:$0xff]   ;;  %v502_v33 = vlaneseq  ;;  %s4747_s3 = scalar_lea.vmem %s4732_s2, %s4045_s12  ;;  %s3947_s27 = smov 112   ;;  %v3954_v0 = vmov 0.0|0.0  }
  0x21   : > { %v456_v3 = vld [vmem:[%s4089_s14] sm:$0xff]  ;;  %v457_v5 = vld [vmem:[%s4089_s14 + $0x8] sm:$0xff]  ;;  %3564 = vmatprep.subr.bf16.mxu0 %v3827_v24  ;;  %s3948_s13 = smov 120   ;;  %s3949_s17 = smov 88   ;;  %3720 = vmatprep.subr.bf16.mxu1 %v3954_v0  ;;  %vm3955_vm4 = vmmov 0   ;;  %v3956_v1 = vmov 0.0  }
  0x22   : > { %v458_v4 = vld [vmem:[%s4089_s14 + $0x10] sm:$0x1]  ;;  %v461_v6 = vsel %vm460_vm2, %v456_v3, 0.0  ;;  %v464_v8 = vsel %vm460_vm2, %v457_v5, 0.0  ;;  %3565 = vmatpush3.bf16.msra.mxu0 %v3827_v24  ;;  %v4106_v36 = vshrl.u32 %v502_v33, 7  ;;  %s3950_s20 = smov 96   ;;  %3578 = vmatprep.mubr.msk.f32.mxu1 %vm3955_vm4, %v3956_v1 }
  0x23   : > { %v468_v7 = vsel %vm467_vm3, %v458_v4, 0.0  ;;  %462 = vadd.xlane.f32.xlu0 %v461_v6  ;;  %3566 = vmatprep.subr.bf16.mxu0 %v3828_v25  ;;  %v459_v38 = vld [vmem:[%s4084_s25] sm:$0x3f]  ;;  %s3951_s23 = smov 80   ;;  %s3952_s28 = smov 72   ;;  %vm1659_vm5 = vcmask 64512  }
  0x24   : > { %469 = vadd.xlane.f32.xlu1 %v468_v7  ;;  %v504_v37 = vsub.s32 0, %v4106_v36  ;;  %v511_v42 = vsub.s32 1, %v4106_v36  ;;  %v3408_v56 = vld [vmem:[%s4747_s3] ss:$0 sm:$0xff]  ;;  %s3953_s15 = smov 104   ;;  %s3957_s16 = smov 64   ;;  %vm4247_vm6 = vmpackc.low %vm1659_vm5, %vm1659_vm5 }
  0x25   : > { %s3958_s19 = smov 56   ;;  %v3959_v6 = vmov 1983009808   ;;  %vm2052_vm7 = vcmask 138240   ;;  %vm2059_vm8 = vcmask 131072   ;;  %s3961_s22 = smov 48  }
  0x26   : > { %3567 = vmatpush3.bf16.msra.mxu0 %v3828_v25  ;;  %v505_v41 = vrot.slane %v459_v38, %v504_v37  ;;  %v512_v48 = vrot.slane %v459_v38, %v511_v42  ;;  %v700_v7 = vunpack.c.l.s4 %v3959_v6  ;;  %s3962_s24 = smov 40   ;;  %vm2195_vm9 = vcmask 1040384   ;;  %s3963_s11 = smov 8  }
  0x27   : > { %465 = vadd.xlane.f32.xlu0 %v464_v8  ;;  %3724 = vmatprep.subr.bf16.mxu0 %v3954_v0  ;;  %v3960_v8 = vmov 1934713408   ;;  %s3964_s0 = smov 16   ;;  %s3965_s1 = smov 24   ;;  %vm2914_vm10 = vcmask 130048   ;;  %vm2918_vm11 = vcmask 195584  }
  0x28   : > { %vm3186_vm12 = vcmask 523264  }
  0xb0   : > { %v463_v9 = vpop.xlane.xlu0 %462 }
  0xb1   : > { %v470_v10 = vpop.xlane.xlu1 %469  ;;  %v472_v11 = vmul.f32 0.03125, %v463_v9  ;;  %v764_v9 = vunpack.c.l.s4 %v3960_v8 }
  0xb2   : > { %v474_v12 = vmul.f32 0.03125, %v470_v10 }
  0xb3   : > { %v475_v13 = vsub.f32 %v456_v3, %v472_v11 }
  0xb4   : > { %v477_v14 = vsub.f32 %v458_v4, %v474_v12  ;;  %v466_v15 = vpop.xlane.xlu0 %465  ;;  %v701_v12 = vunpack.c.0.s8 %v700_v7 }
  0xb5   : > { %v473_v16 = vmul.f32 0.03125, %v466_v15  ;;  %v478_v17 = vmul.f32 %v475_v13, %v475_v13 }
  0xb6   : > { %v480_v18 = vmul.f32 %v477_v14, %v477_v14 }
  0xb7   : > { %v476_v19 = vsub.f32 %v457_v5, %v473_v16  ;;  %v481_v20 = vsel %vm460_vm2, %v478_v17, 0.0 }
  0xb8   : > { %482 = vadd.xlane.f32.xlu1 %v481_v20  ;;  %v487_v21 = vsel %vm467_vm3, %v480_v18, 0.0  ;;  %v4163_v18 = vsub.s32 %v701_v12, %v4106_v36 }
  0xb9   : > { %v479_v22 = vmul.f32 %v476_v19, %v476_v19 }
  0xbb   : > { %v484_v23 = vsel %vm460_vm2, %v479_v22, 0.0 }
  0xbc   : > { %488 = vadd.xlane.f32.xlu1 %v487_v21  ;;  %485 = vadd.xlane.f32.xlu0 %v484_v23 }
 0x145   : > { %v483_v26 = vpop.xlane.xlu1 %482 }
 0x146   : > { %v490_v27 = vmul.f32 0.03125, %v483_v26 }
 0x148   : > { %v493_v28 = vadd.f32 1e-12, %v490_v27 }
 0x149   : > { %v489_v29 = vpop.xlane.xlu1 %488  ;;  %v486_v30 = vpop.xlane.xlu0 %485 }
 0x14a   : > { %3837 = vrsqrt.f32 %v493_v28  ;;  %v492_v31 = vmul.f32 0.03125, %v489_v29  ;;  %v491_v32 = vmul.f32 0.03125, %v486_v30 }
 0x14c   : > { %v495_v34 = vadd.f32 1e-12, %v492_v31  ;;  %v494_v35 = vadd.f32 1e-12, %v491_v32 }
 0x14e   : > { %3839 = vrsqrt.f32 %v495_v34 }
 0x14f   : > { %3841 = vrsqrt.f32 %v494_v35 }
 0x154   : > { %v3838_v39 = vpop.eup %3837 }
 0x155   : > { %v499_v40 = vmul.f32 %v3838_v39, %v475_v13  ;;  %v765_v13 = vunpack.c.0.s8 %v764_v9 }
 0x157   : > { %v506_v47 = vmul.f32 %v505_v41, %v499_v40  ;;  %v4166_v21 = vsub.s32 %v765_v13, %v4106_v36 }
 0x158   : > { %v3840_v43 = vpop.eup %3839 }
 0x159   : > { %v3842_v44 = vpop.eup %3841  ;;  %v501_v45 = vmul.f32 %v3840_v43, %v477_v14  ;;  %v513_v52 = vadd.f32 %v512_v48, %v506_v47 }
 0x15a   : > { %v500_v46 = vmul.f32 %v3842_v44, %v476_v19 }
 0x15b   : > { %v508_v49 = vmul.f32 %v505_v41, %v501_v45 }
 0x15c   : > { %v507_v50 = vmul.f32 %v505_v41, %v500_v46 }
 0x15d   : > { %v515_v51 = vadd.f32 %v512_v48, %v508_v49 }
 0x15e   : > { %v514_v53 = vadd.f32 %v512_v48, %v507_v50 }
 0x15f   : > { %v517_v54 = vpack.c.bf16 %v515_v51, %v515_v51 }
 0x160   : > { %v516_v55 = vpack.c.bf16 %v514_v53, %v513_v52 }
 0x162   : > { %3568 = vmatprep.mubr.msk.bf16.mxu0 %vm460_vm2, %v516_v55 }
 0x163   : > { %3569 = vmatmul.mubr.msk.bf16.vlgmr.msra.gmra.mrb[0].mxu0 %vm460_vm2, %v517_v54 }
 0x164   : > { %3593 = vmatprep.mubr.msk.f32.mxu0 %vm3955_vm4, %v3956_v1 }
 0x236   : > { %v3570_v57 = vpop.f32.mrb[0].mxu0 }
 0x237   : > { %v4118_v58 = vadd.f32 %v3570_v57, %v3408_v56  ;;  %v581_v59 = vpop.f32.mrb[1].mxu0 }
 0x238   : > { %v3571_v60 = vpop.f32.mrb[2].mxu0  ;;  %v4123_v62 = vadd.f32 %v3408_v56, %v581_v59 }
 0x239   : > { %611 = vrot.lane.b32.xlu1 %v4118_v58, %s3947_s27  ;;  %602 = vrot.lane.b32.xlu0 %v4118_v58, %s3948_s13  ;;  %v584_v61 = vpop.f32.mrb[3].mxu0 }
 0x23a   : > { %v4127_v63 = vadd.f32 %v3408_v56, %v584_v61 }
 0x23d   : > { %634 = vrot.lane.b32.xlu1 %v4123_v62, %s3949_s17  ;;  %625 = vrot.lane.b32.xlu0 %v4123_v62, %s3950_s20 }
 0x241   : > { %627 = vrot.lane.b32.xlu1 %v4127_v63, %s3950_s20  ;;  %643 = vrot.lane.b32.xlu0 %v4123_v62, %s3951_s23 }
 0x245   : > { %636 = vrot.lane.b32.xlu1 %v4127_v63, %s3949_s17  ;;  %652 = vrot.lane.b32.xlu0 %v4123_v62, %s3952_s28 }
 0x249   : > { %645 = vrot.lane.b32.xlu1 %v4127_v63, %s3951_s23  ;;  %620 = vrot.lane.b32.xlu0 %v4118_v58, %s3953_s15 }
 0x24d   : > { %654 = vrot.lane.b32.xlu1 %v4127_v63, %s3952_s28  ;;  %638 = vrot.lane.b32.xlu0 %v4118_v58, %s3949_s17 }
 0x251   : > { %629 = vrot.lane.b32.xlu1 %v4118_v58, %s3950_s20  ;;  %656 = vrot.lane.b32.xlu0 %v4118_v58, %s3952_s28 }
 0x255   : > { %647 = vrot.lane.b32.xlu1 %v4118_v58, %s3951_s23  ;;  %607 = vrot.lane.b32.xlu0 %v4123_v62, %s3947_s27 }
 0x259   : > { %598 = vrot.lane.b32.xlu1 %v4123_v62, %s3948_s13  ;;  %600 = vrot.lane.b32.xlu0 %v4127_v63, %s3948_s13 }
 0x25d   : > { %616 = vrot.lane.b32.xlu1 %v4123_v62, %s3953_s15  ;;  %618 = vrot.lane.b32.xlu0 %v4127_v63, %s3953_s15 }
 0x261   : > { %609 = vrot.lane.b32.xlu1 %v4127_v63, %s3947_s27  ;;  %661 = vrot.lane.b32.xlu0 %v4123_v62, %s3957_s16 }
 0x265   : > { %670 = vrot.lane.b32.xlu1 %v4123_v62, %s3958_s19 }
 0x269   : > { %663 = vrot.lane.b32.xlu1 %v4127_v63, %s3957_s16 }
 0x26d   : > { %672 = vrot.lane.b32.xlu1 %v4127_v63, %s3958_s19 }
 0x2ab   : > { %v612_v2 = vpop.permute.xlu1 %611  ;;  %v603_v3 = vpop.permute.xlu0 %602 }
 0x2ac   : > { %v1105_v32 = vcombine.low %v4118_v58, %v612_v2 }
 0x2ae   : > { %v1112_v49 = vrot.slane %v1105_v32, %v4163_v18 }
 0x2af   : > { %v635_v4 = vpop.permute.xlu1 %634  ;;  %v626_v5 = vpop.permute.xlu0 %625 }
 0x2b3   : > { %v628_v10 = vpop.permute.xlu1 %627  ;;  %v644_v11 = vpop.permute.xlu0 %643 }
 0x2b4   : > { %v729_v14 = vcombine.low %v626_v5, %v644_v11  ;;  %v730_v15 = vcombine.high %v626_v5, %v644_v11 }
 0x2b6   : > { %v737_v22 = vrot.slane %v729_v14, %v4163_v18  ;;  %v744_v23 = vrot.slane %v730_v15, %v4163_v18 }
 0x2b7   : > { %v637_v16 = vpop.permute.xlu1 %636  ;;  %v653_v17 = vpop.permute.xlu0 %652 }
 0x2b8   : > { %v745_v19 = vcombine.low %v635_v4, %v653_v17  ;;  %v746_v20 = vcombine.high %v635_v4, %v653_v17 }
 0x2ba   : > { %v753_v24 = vrot.slane %v745_v19, %v4163_v18  ;;  %v760_v25 = vrot.slane %v746_v20, %v4163_v18 }
 0x2bb   : > { %v646_v26 = vpop.permute.xlu1 %645  ;;  %v621_v27 = vpop.permute.xlu0 %620 }
 0x2bc   : > { %v793_v28 = vcombine.low %v737_v22, %v753_v24  ;;  %v794_v29 = vcombine.high %v737_v22, %v753_v24  ;;  %v809_v30 = vcombine.low %v744_v23, %v760_v25  ;;  %v810_v31 = vcombine.high %v744_v23, %v760_v25 }
 0x2bd   : > { %v1113_v33 = vcombine.low %v603_v3, %v621_v27  ;;  %v933_v39 = vcombine.low %v628_v10, %v646_v26  ;;  %v934_v40 = vcombine.high %v628_v10, %v646_v26 }
 0x2be   : > { %v801_v34 = vrot.slane %v793_v28, %v4166_v21  ;;  %v808_v35 = vrot.slane %v794_v29, %v4166_v21  ;;  %v817_v37 = vrot.slane %v809_v30, %v4166_v21  ;;  %v824_v38 = vrot.slane %v810_v31, %v4166_v21 }
 0x2bf   : > { %v655_v41 = vpop.permute.xlu1 %654  ;;  %v639_v42 = vpop.permute.xlu0 %638  ;;  %v1120_v52 = vrot.slane %v1113_v33, %v4163_v18  ;;  %v941_v53 = vrot.slane %v933_v39, %v4163_v18  ;;  %v948_v54 = vrot.slane %v934_v40, %v4163_v18 }
 0x2c0   : > { %v3414_v43 = vcombine.low %v801_v34, %v808_v35  ;;  %v3416_v44 = vcombine.high %v801_v34, %v808_v35  ;;  %v3418_v45 = vcombine.low %v817_v37, %v824_v38  ;;  %v3420_v46 = vcombine.high %v817_v37, %v824_v38 }
 0x2c1   : > { %v949_v47 = vcombine.low %v637_v16, %v655_v41  ;;  %v950_v48 = vcombine.high %v637_v16, %v655_v41  ;;  %v1137_v8 = vcombine.low %v1112_v49, %v1120_v52 }
 0x2c2   : > { %v4179_v50 = vrot.slane %v3414_v43, %v4163_v18  ;;  %v4182_v51 = vrot.slane %v3416_v44, %v4163_v18  ;;  %v4190_v60 = vrot.slane %v3418_v45, %v4163_v18  ;;  %v4193_v61 = vrot.slane %v3420_v46, %v4163_v18 }
 0x2c3   : > { %v957_v55 = vrot.slane %v949_v47, %v4163_v18  ;;  %v964_v56 = vrot.slane %v950_v48, %v4163_v18  ;;  %v630_v57 = vpop.permute.xlu1 %629  ;;  %v657_v59 = vpop.permute.xlu0 %656  ;;  %v1144_v37 = vrot.slane %v1137_v8, %v4166_v21 }
 0x2c4   : > { %v1129_v2 = vcombine.low %v639_v42, %v657_v59  ;;  %v1251_v3 = vcombine.low %v4179_v50, %v4182_v51  ;;  %v1283_v19 = vcombine.low %v4190_v60, %v4193_v61  ;;  %v1252_v40 = vcombine.high %v4179_v50, %v4182_v51 }
 0x2c5   : > { %v997_v4 = vcombine.low %v941_v53, %v957_v55  ;;  %v998_v5 = vcombine.high %v941_v53, %v957_v55  ;;  %v1013_v6 = vcombine.low %v948_v54, %v964_v56  ;;  %v1014_v7 = vcombine.high %v948_v54, %v964_v56 }
 0x2c6   : > { %v1136_v15 = vrot.slane %v1129_v2, %v4163_v18  ;;  %v1259_v17 = vrot.slane %v1251_v3, %v4166_v21  ;;  %v1291_v28 = vrot.slane %v1283_v19, %v4166_v21  ;;  %v1284_v41 = vcombine.high %v4190_v60, %v4193_v61 }
 0x2c7   : > { %v1005_v9 = vrot.slane %v997_v4, %v4166_v21  ;;  %v1012_v10 = vrot.slane %v998_v5, %v4166_v21  ;;  %v1021_v11 = vrot.slane %v1013_v6, %v4166_v21  ;;  %v1028_v12 = vrot.slane %v1014_v7, %v4166_v21  ;;  %v648_v13 = vpop.permute.xlu1 %647  ;;  %v608_v14 = vpop.permute.xlu0 %607 }
 0x2c8   : > { %v1121_v16 = vcombine.low %v630_v57, %v648_v13  ;;  %v697_v26 = vcombine.low %v4123_v62, %v608_v14  ;;  %v698_v27 = vcombine.high %v4123_v62, %v608_v14  ;;  %v1303_v47 = vcombine.low %v1259_v17, %v1291_v28 }
 0x2c9   : > { %v3422_v20 = vcombine.low %v1005_v9, %v1012_v10  ;;  %v3424_v22 = vcombine.high %v1005_v9, %v1012_v10  ;;  %v3426_v23 = vcombine.low %v1021_v11, %v1028_v12  ;;  %v3428_v24 = vcombine.high %v1021_v11, %v1028_v12 }
 0x2ca   : > { %v1128_v25 = vrot.slane %v1121_v16, %v4163_v18  ;;  %v705_v43 = vrot.slane %v697_v26, %v4163_v18  ;;  %v712_v44 = vrot.slane %v698_v27, %v4163_v18  ;;  %v1304_v57 = vcombine.high %v1259_v17, %v1291_v28 }
 0x2cb   : > { %v4210_v29 = vrot.slane %v3422_v20, %v4163_v18  ;;  %v4213_v30 = vrot.slane %v3424_v22, %v4163_v18  ;;  %v4216_v31 = vrot.slane %v3426_v23, %v4163_v18  ;;  %v4219_v32 = vrot.slane %v3428_v24, %v4163_v18  ;;  %v599_v33 = vpop.permute.xlu1 %598  ;;  %v601_v34 = vpop.permute.xlu0 %600 }
 0x2cc   : > { %v1145_v35 = vcombine.low %v1128_v25, %v1136_v15 }
 0x2cd   : > { %v1387_v38 = vcombine.low %v4210_v29, %v4213_v30  ;;  %v1419_v39 = vcombine.low %v4216_v31, %v4219_v32  ;;  %v1388_v56 = vcombine.high %v4210_v29, %v4213_v30  ;;  %v1420_v3 = vcombine.high %v4216_v31, %v4219_v32 }
 0x2ce   : > { %v1152_v42 = vrot.slane %v1145_v35, %v4166_v21 }
 0x2cf   : > { %v617_v45 = vpop.permute.xlu1 %616  ;;  %v619_v46 = vpop.permute.xlu0 %618  ;;  %v1395_v48 = vrot.slane %v1387_v38, %v4166_v21  ;;  %v1427_v49 = vrot.slane %v1419_v39, %v4166_v21  ;;  %v1402_v39 = vrot.slane %v1388_v56, %v4166_v21 }
 0x2d0   : > { %v4235_v52 = vcombine.low %v1144_v37, %v1152_v42  ;;  %v713_v53 = vcombine.low %v599_v33, %v617_v45  ;;  %v714_v54 = vcombine.high %v599_v33, %v617_v45  ;;  %v917_v55 = vcombine.low %v601_v34, %v619_v46 }
 0x2d1   : > { %v1439_v59 = vcombine.low %v1395_v48, %v1427_v49  ;;  %v1440_v2 = vcombine.high %v1395_v48, %v1427_v49  ;;  %v918_v8 = vcombine.high %v601_v34, %v619_v46  ;;  %v1434_v42 = vrot.slane %v1420_v3, %v4166_v21 }
 0x2d2   : > { %v1443_v4 = vcombine.high %v4235_v52, %v3956_v1  ;;  %v721_v5 = vrot.slane %v713_v53, %v4163_v18  ;;  %v728_v6 = vrot.slane %v714_v54, %v4163_v18  ;;  %v925_v9 = vrot.slane %v917_v55, %v4163_v18 }
 0x2d3   : > { %v610_v10 = vpop.permute.xlu1 %609  ;;  %v3721_v11 = vpack.c.bf16 %v1439_v59, %v1303_v47  ;;  %v3725_v12 = vpack.c.bf16 %v1440_v2, %v1304_v57  ;;  %v932_v26 = vrot.slane %v918_v8, %v4163_v18  ;;  %v1266_v3 = vrot.slane %v1252_v40, %v4166_v21 }
 0x2d4   : > { %v761_v13 = vcombine.low %v705_v43, %v721_v5  ;;  %v762_v14 = vcombine.high %v705_v43, %v721_v5  ;;  %v777_v15 = vcombine.low %v712_v44, %v728_v6  ;;  %v778_v16 = vcombine.high %v712_v44, %v728_v6 }
 0x2d5   : > { %v901_v17 = vcombine.low %v4127_v63, %v610_v10  ;;  %v902_v19 = vcombine.high %v4127_v63, %v610_v10  ;;  %3723 = vmatpush3.bf16.xpose.msk.msra.mxu1 %vm4247_vm6, %v3721_v11  ;;  %3727 = vmatpush3.bf16.xpose.msk.msra.mxu0 %vm4247_vm6, %v3725_v12  ;;  %v1457_v20 = vrot.slane %v1443_v4, %v4163_v18 }
 0x2d6   : > { %v769_v22 = vrot.slane %v761_v13, %v4166_v21  ;;  %v776_v23 = vrot.slane %v762_v14, %v4166_v21  ;;  %v785_v24 = vrot.slane %v777_v15, %v4166_v21  ;;  %v792_v25 = vrot.slane %v778_v16, %v4166_v21  ;;  %3576 = vmatprep.subr.mxu1 %v3956_v1 }
 0x2d7   : > { %v909_v27 = vrot.slane %v901_v17, %v4163_v18  ;;  %v916_v28 = vrot.slane %v902_v19, %v4163_v18  ;;  %3591 = vmatprep.subr.mxu0 %v3956_v1  ;;  %v1480_v29 = vrot.slane %v1457_v20, %v4166_v21  ;;  %v1298_v4 = vrot.slane %v1284_v41, %v4166_v21 }
 0x2d8   : > { %v3413_v30 = vcombine.low %v769_v22, %v776_v23  ;;  %v3415_v31 = vcombine.high %v769_v22, %v776_v23  ;;  %v3417_v32 = vcombine.low %v785_v24, %v792_v25  ;;  %v3419_v33 = vcombine.high %v785_v24, %v792_v25 }
 0x2d9   : > { %v965_v34 = vcombine.low %v909_v27, %v925_v9  ;;  %v966_v35 = vcombine.high %v909_v27, %v925_v9  ;;  %v981_v37 = vcombine.low %v916_v28, %v932_v26  ;;  %v982_v38 = vcombine.high %v916_v28, %v932_v26 }
 0x2da   : > { %v1179_v43 = vrot.slane %v3413_v30, %v4163_v18  ;;  %v1195_v44 = vrot.slane %v3415_v31, %v4163_v18  ;;  %v1211_v49 = vrot.slane %v3417_v32, %v4163_v18  ;;  %v1227_v53 = vrot.slane %v3419_v33, %v4163_v18 }
 0x2db   : > { %v973_v45 = vrot.slane %v965_v34, %v4166_v21  ;;  %v980_v46 = vrot.slane %v966_v35, %v4166_v21  ;;  %v989_v47 = vrot.slane %v981_v37, %v4166_v21  ;;  %v996_v48 = vrot.slane %v982_v38, %v4166_v21 }
 0x2dc   : > { %v1490_v54 = vcombine.high %v1480_v29, %v3956_v1  ;;  %v1235_v55 = vcombine.low %v1179_v43, %v1195_v44  ;;  %v1267_v51 = vcombine.low %v1211_v49, %v1227_v53  ;;  %v1441_v40 = vcombine.low %v1402_v39, %v1434_v42 }
 0x2dd   : > { %v3421_v56 = vcombine.low %v973_v45, %v980_v46  ;;  %v3423_v57 = vcombine.high %v973_v45, %v980_v46  ;;  %v3425_v59 = vcombine.low %v989_v47, %v996_v48  ;;  %v3427_v2 = vcombine.high %v989_v47, %v996_v48  ;;  %3577 = vmatpush3.xpose.msk.msra.mxu1 %vm1659_vm5, %v1480_v29 }
 0x2de   : > { %3592 = vmatpush3.xpose.msk.msra.mxu0 %vm1659_vm5, %v1490_v54  ;;  %3728 = vmatprep.subr.bf16.mxu1 %v3954_v0  ;;  %v1243_v50 = vrot.slane %v1235_v55, %v4166_v21  ;;  %v1442_v60 = vcombine.high %v1402_v39, %v1434_v42  ;;  %v1275_v10 = vrot.slane %v1267_v51, %v4166_v21 }
 0x2df   : > { %v1315_v5 = vrot.slane %v3421_v56, %v4163_v18  ;;  %v1331_v6 = vrot.slane %v3423_v57, %v4163_v18  ;;  %v1347_v8 = vrot.slane %v3425_v59, %v4163_v18  ;;  %v1363_v9 = vrot.slane %v3427_v2, %v4163_v18  ;;  %3732 = vmatprep.subr.bf16.mxu0 %v3954_v0 }
 0x2e0   : > { %v1305_v11 = vcombine.low %v1266_v3, %v1298_v4  ;;  %v1306_v12 = vcombine.high %v1266_v3, %v1298_v4  ;;  %v1299_v15 = vcombine.low %v1243_v50, %v1275_v10  ;;  %v1300_v16 = vcombine.high %v1243_v50, %v1275_v10 }
 0x2e1   : > { %v1371_v61 = vcombine.low %v1315_v5, %v1331_v6  ;;  %v1403_v41 = vcombine.low %v1347_v8, %v1363_v9  ;;  %v1450_v17 = vrot.slane %v4235_v52, %v4163_v18  ;;  %v1473_v19 = vcombine.high %v1457_v20, %v3956_v1 }
 0x2e2   : > { %v3729_v22 = vpack.c.bf16 %v1441_v40, %v1305_v11  ;;  %v3733_v23 = vpack.c.bf16 %v1442_v60, %v1306_v12  ;;  %3579 = vmatmul.mubr.msk.f32.vlgmr.msra.gmra.mrb[0].mxu1 %vm1659_vm5, %v1299_v15  ;;  %3594 = vmatmul.mubr.msk.f32.vlgmr.msra.gmra.mrb[4].mxu0 %vm1659_vm5, %v1300_v16  ;;  %v1236_v26 = vcombine.high %v1179_v43, %v1195_v44 }
 0x2e3   : > { %v1379_v13 = vrot.slane %v1371_v61, %v4166_v21  ;;  %v1411_v14 = vrot.slane %v1403_v41, %v4166_v21  ;;  %v1268_v27 = vcombine.high %v1211_v49, %v1227_v53  ;;  %3581 = vmatprep.mubr.msk.f32.mxu1 %vm3955_vm4, %v3956_v1  ;;  %3596 = vmatprep.mubr.msk.f32.mxu0 %vm3955_vm4, %v3956_v1 }
 0x2e4   : > { %3731 = vmatpush3.bf16.xpose.msk.msra.mxu1 %vm4247_vm6, %v3729_v22  ;;  %3735 = vmatpush3.bf16.xpose.msk.msra.mxu0 %vm4247_vm6, %v3733_v23  ;;  %v1465_v52 = vrot.slane %v1450_v17, %v4166_v21  ;;  %v1487_v20 = vrot.slane %v1473_v19, %v4166_v21  ;;  %v1250_v7 = vrot.slane %v1236_v26, %v4166_v21 }
 0x2e5   : > { %v1435_v24 = vcombine.low %v1379_v13, %v1411_v14  ;;  %v1436_v25 = vcombine.high %v1379_v13, %v1411_v14  ;;  %3606 = vmatprep.subr.mxu1 %v3956_v1  ;;  %3621 = vmatprep.subr.mxu0 %v3956_v1  ;;  %v1282_v28 = vrot.slane %v1268_v27, %v4166_v21  ;;  %v4421_v27 = vpop.permute.xlu0 %661 }
 0x2e6   : > { %v1488_v29 = vcombine.high %v1465_v52, %v3956_v1  ;;  %v1372_v30 = vcombine.high %v1315_v5, %v1331_v6  ;;  %v1404_v31 = vcombine.high %v1347_v8, %v1363_v9  ;;  %v1491_v32 = vcombine.high %v1487_v20, %v3956_v1 }
 0x2e7   : > { %3582 = vmatmul.mubr.msk.f32.gmra.mrb[2].mxu1 %vm1659_vm5, %v1435_v24  ;;  %3597 = vmatmul.mubr.msk.f32.gmra.mrb[6].mxu0 %vm1659_vm5, %v1436_v25  ;;  %v1301_v33 = vcombine.low %v1250_v7, %v1282_v28  ;;  %v1302_v34 = vcombine.high %v1250_v7, %v1282_v28  ;;  %v1458_v38 = vcombine.high %v1450_v17, %v3956_v1  ;;  %v4419_v25 = vpop.permute.xlu1 %670 }
 0x2e8   : > { %3584 = vmatprep.mubr.msk.f32.mxu1 %vm3955_vm4, %v3956_v1  ;;  %3599 = vmatprep.mubr.msk.f32.mxu0 %vm3955_vm4, %v3956_v1  ;;  %v1386_v35 = vrot.slane %v1372_v30, %v4166_v21  ;;  %v1418_v37 = vrot.slane %v1404_v31, %v4166_v21 }
 0x2e9   : > { %v1472_v43 = vrot.slane %v1458_v38, %v4166_v21 }
 0x2ea   : > { %v1437_v39 = vcombine.low %v1386_v35, %v1418_v37  ;;  %v1438_v42 = vcombine.high %v1386_v35, %v1418_v37 }
 0x2eb   : > { %3585 = vmatmul.mubr.msk.f32.gmra.mrb[4].mxu1 %vm1659_vm5, %v1465_v52  ;;  %3600 = vmatmul.mubr.msk.f32.gmra.mrb[8].mxu0 %vm1659_vm5, %v1488_v29  ;;  %v1489_v44 = vcombine.high %v1472_v43, %v3956_v1  ;;  %v664_v26 = vpop.permute.xlu1 %663 }
 0x2ec   : > { %3607 = vmatpush3.xpose.msk.msra.mxu1 %vm1659_vm5, %v1487_v20  ;;  %3622 = vmatpush3.xpose.msk.msra.mxu0 %vm1659_vm5, %v1491_v32 }
 0x2ed   : > { %3608 = vmatprep.mubr.msk.f32.mxu1 %vm3955_vm4, %v3956_v1  ;;  %3623 = vmatprep.mubr.msk.f32.mxu0 %vm3955_vm4, %v3956_v1 }
 0x2ee   : > { %3736 = vmatprep.subr.bf16.mxu0 %v3954_v0  ;;  %3748 = vmatprep.subr.bf16.mxu1 %v3954_v0 }
 0x2ef   : > { %3609 = vmatmul.mubr.msk.f32.vlgmr.msra.gmra.mrb[6].mxu1 %vm1659_vm5, %v1301_v33  ;;  %3624 = vmatmul.mubr.msk.f32.vlgmr.msra.gmra.mrb[10].mxu0 %vm1659_vm5, %v1302_v34  ;;  %v673_v52 = vpop.permute.xlu1 %672 }
 0x2f0   : > { %3611 = vmatprep.mubr.msk.f32.mxu1 %vm3955_vm4, %v3956_v1  ;;  %3626 = vmatprep.mubr.msk.f32.mxu0 %vm3955_vm4, %v3956_v1 }
 0x2f3   : > { %3612 = vmatmul.mubr.msk.f32.gmra.mrb[8].mxu1 %vm1659_vm5, %v1437_v39  ;;  %3627 = vmatmul.mubr.msk.f32.gmra.mrb[12].mxu0 %vm1659_vm5, %v1438_v42 }
 0x2f4   : > { %3614 = vmatprep.mubr.msk.f32.mxu1 %vm3955_vm4, %v3956_v1  ;;  %3629 = vmatprep.mubr.msk.f32.mxu0 %vm3955_vm4, %v3956_v1 }
 0x2f7   : > { %3615 = vmatmul.mubr.msk.f32.gmra.mrb[10].mxu1 %vm1659_vm5, %v1472_v43  ;;  %3630 = vmatmul.mubr.msk.f32.gmra.mrb[14].mxu0 %vm1659_vm5, %v1489_v44 }
 0x2f8   : > { %3638 = vmatprep.mubr.msk.f32.mxu0 %vm3955_vm4, %v3956_v1  ;;  %3641 = vmatprep.mubr.msk.f32.mxu1 %vm3955_vm4, %v3956_v1 }
 0x3b5   : > { %v4360_v45 = vpop.f32.mrb[0].mxu1  ;;  %v4362_v46 = vpop.f32.mrb[4].mxu0 }
 0x3b6   : > { %v3580_v47 = vpop.f32.mrb[1].mxu1  ;;  %v3595_v48 = vpop.f32.mrb[5].mxu0  ;;  %v2063_v49 = vsel %vm2052_vm7, %v4362_v46, -inf  ;;  %v2053_v53 = vsel %vm2052_vm7, %v4360_v45, -inf }
 0x3b7   : > { %2064 = vmax.xlane.f32.xlu0 %v2063_v49  ;;  %2054 = vmax.xlane.f32.xlu1 %v2053_v53 }
 0x3ba   : > { %v4368_v54 = vpop.f32.mrb[2].mxu1  ;;  %v4370_v55 = vpop.f32.mrb[6].mxu0 }
 0x3bb   : > { %v3583_v56 = vpop.f32.mrb[3].mxu1  ;;  %v3598_v57 = vpop.f32.mrb[7].mxu0  ;;  %v2056_v59 = vsel %vm2052_vm7, %v4368_v54, -inf  ;;  %v2066_v6 = vsel %vm2052_vm7, %v4370_v55, -inf }
 0x3bc   : > { %2057 = vmax.xlane.f32.xlu0 %v2056_v59 }
 0x3be   : > { %v4374_v2 = vpop.f32.mrb[4].mxu1  ;;  %v4376_v3 = vpop.f32.mrb[8].mxu0 }
 0x3bf   : > { %v3586_v4 = vpop.f32.mrb[5].mxu1  ;;  %v3601_v5 = vpop.f32.mrb[9].mxu0  ;;  %v2060_v8 = vsel %vm2059_vm8, %v4374_v2, -inf  ;;  %v2069_v60 = vsel %vm2059_vm8, %v4376_v3, -inf }
 0x3c0   : > { %2067 = vmax.xlane.f32.xlu0 %v2066_v6  ;;  %2061 = vmax.xlane.f32.xlu1 %v2060_v8 }
 0x3c2   : > { %v4382_v9 = vpop.f32.mrb[6].mxu1  ;;  %v4384_v50 = vpop.f32.mrb[10].mxu0 }
 0x3c3   : > { %v3610_v51 = vpop.f32.mrb[7].mxu1  ;;  %v3625_v40 = vpop.f32.mrb[11].mxu0  ;;  %v2072_v61 = vsel %vm2052_vm7, %v4382_v9, -inf  ;;  %v2081_v13 = vsel %vm2052_vm7, %v4384_v50, -inf }
 0x3c4   : > { %2070 = vmax.xlane.f32.xlu0 %v2069_v60  ;;  %2073 = vmax.xlane.f32.xlu1 %v2072_v61 }
 0x3c6   : > { %v4390_v41 = vpop.f32.mrb[8].mxu1  ;;  %v4392_v10 = vpop.f32.mrb[12].mxu0 }
 0x3c7   : > { %v3613_v11 = vpop.f32.mrb[9].mxu1  ;;  %v3628_v12 = vpop.f32.mrb[13].mxu0  ;;  %v2075_v14 = vsel %vm2052_vm7, %v4390_v41, -inf  ;;  %v2084_v22 = vsel %vm2052_vm7, %v4392_v10, -inf }
 0x3c8   : > { %2082 = vmax.xlane.f32.xlu0 %v2081_v13  ;;  %2076 = vmax.xlane.f32.xlu1 %v2075_v14 }
 0x3ca   : > { %v4398_v15 = vpop.f32.mrb[10].mxu1  ;;  %v4400_v16 = vpop.f32.mrb[14].mxu0 }
 0x3cb   : > { %v3616_v17 = vpop.f32.mrb[11].mxu1  ;;  %v3631_v19 = vpop.f32.mrb[15].mxu0  ;;  %v2078_v23 = vsel %vm2059_vm8, %v4398_v15, -inf  ;;  %v2087_v24 = vsel %vm2059_vm8, %v4400_v16, -inf }
 0x3cc   : > { %2085 = vmax.xlane.f32.xlu0 %v2084_v22  ;;  %2079 = vmax.xlane.f32.xlu1 %v2078_v23 }
 0x3d0   : > { %2088 = vmax.xlane.f32.xlu0 %v2087_v24 }
 0x3dd   : > { %681 = vrot.lane.b32.xlu1 %v4127_v63, %s3961_s22 }
 0x3e1   : > { %690 = vrot.lane.b32.xlu1 %v4127_v63, %s3962_s24 }
 0x3e5   : > { %674 = vrot.lane.b32.xlu1 %v4118_v58, %s3958_s19 }
 0x3e6   : > { %679 = vrot.lane.b32.xlu0 %v4123_v62, %s3961_s22 }
 0x3ea   : > { %688 = vrot.lane.b32.xlu0 %v4123_v62, %s3962_s24 }
 0x3ee   : > { %665 = vrot.lane.b32.xlu0 %v4118_v58, %s3957_s16 }
 0x3f2   : > { %692 = vrot.lane.b32.xlu0 %v4118_v58, %s3962_s24 }
 0x444   : > { %v2055_v63 = vpop.xlane.xlu1 %2054  ;;  %v2065_v20 = vpop.xlane.xlu0 %2064 }
 0x445   : > { %v2090_v7 = vsub.f32 %v4360_v45, %v2055_v63  ;;  %v2093_v28 = vsub.f32 %v4362_v46, %v2065_v20 }
 0x447   : > { %v2102_v29 = vmul.f32 1.442695, %v2090_v7  ;;  %v2108_v30 = vmul.f32 1.442695, %v2093_v28 }
 0x449   : > { %v4425_v62 = vpop.xlane.xlu0 %2057  ;;  %3843 = vpow2.f32 %v2102_v29 }
 0x44a   : > { %3845 = vpow2.f32 %v2108_v30 }
 0x44d   : > { %v4427_v31 = vpop.xlane.xlu1 %2061  ;;  %v2068_v32 = vpop.xlane.xlu0 %2067 }
 0x44e   : > { %v2094_v33 = vsub.f32 %v4370_v55, %v2068_v32 }
 0x450   : > { %v2110_v34 = vmul.f32 1.442695, %v2094_v33 }
 0x451   : > { %v2074_v35 = vpop.xlane.xlu1 %2073  ;;  %v2071_v37 = vpop.xlane.xlu0 %2070 }
 0x452   : > { %v2096_v38 = vsub.f32 %v4382_v9, %v2074_v35  ;;  %v2095_v39 = vsub.f32 %v4376_v3, %v2071_v37  ;;  %3847 = vpow2.f32 %v2110_v34 }
 0x453   : > { %v4432_v42 = vpop.eup %3843 }
 0x454   : > { %v2112_v43 = vmul.f32 1.442695, %v2095_v39  ;;  %v4434_v44 = vpop.eup %3845  ;;  %v2126_v47 = vsel %vm2052_vm7, %v4432_v42, 0.0  ;;  %v2114_v48 = vmul.f32 1.442695, %v2096_v38 }
 0x455   : > { %v4436_v45 = vpop.xlane.xlu1 %2076  ;;  %v2083_v46 = vpop.xlane.xlu0 %2082  ;;  %2127 = vadd.xlane.f32.xlu1 %v2126_v47  ;;  %v2135_v53 = vsel %vm2052_vm7, %v4434_v44, 0.0 }
 0x456   : > { %v2099_v49 = vsub.f32 %v4384_v50, %v2083_v46  ;;  %3849 = vpow2.f32 %v2112_v43  ;;  %2136 = vadd.xlane.f32.xlu0 %v2135_v53 }
 0x457   : > { %3851 = vpow2.f32 %v2114_v48 }
 0x458   : > { %v2120_v55 = vmul.f32 1.442695, %v2099_v49 }
 0x459   : > { %v4443_v56 = vpop.xlane.xlu1 %2079  ;;  %v2086_v57 = vpop.xlane.xlu0 %2085 }
 0x45a   : > { %v2100_v59 = vsub.f32 %v4392_v10, %v2086_v57  ;;  %3853 = vpow2.f32 %v2120_v55 }
 0x45c   : > { %v4446_v3 = vpop.eup %3847  ;;  %v2122_v4 = vmul.f32 1.442695, %v2100_v59 }
 0x45d   : > { %v682_v5 = vpop.permute.xlu1 %681  ;;  %v2089_v6 = vpop.xlane.xlu0 %2088  ;;  %v2138_v9 = vsel %vm2052_vm7, %v4446_v3, 0.0 }
 0x45e   : > { %v2101_v8 = vsub.f32 %v4400_v16, %v2089_v6  ;;  %v1037_v50 = vcombine.low %v664_v26, %v682_v5  ;;  %v1038_v51 = vcombine.high %v664_v26, %v682_v5  ;;  %2139 = vadd.xlane.f32.xlu0 %v2138_v9  ;;  %3855 = vpow2.f32 %v2122_v4 }
 0x460   : > { %v4451_v40 = vpop.eup %3849  ;;  %v2124_v60 = vmul.f32 1.442695, %v2101_v8  ;;  %v1045_v17 = vrot.slane %v1037_v50, %v4163_v18  ;;  %v1052_v19 = vrot.slane %v1038_v51, %v4163_v18 }
 0x461   : > { %v691_v61 = vpop.permute.xlu1 %690  ;;  %v680_v10 = vpop.permute.xlu0 %679  ;;  %v2141_v14 = vsel %vm2059_vm8, %v4451_v40, 0.0 }
 0x462   : > { %v1053_v11 = vcombine.low %v673_v52, %v691_v61  ;;  %v1054_v12 = vcombine.high %v673_v52, %v691_v61  ;;  %v833_v13 = vcombine.low %v4421_v27, %v680_v10  ;;  %v4456_v16 = vpop.eup %3851  ;;  %2142 = vadd.xlane.f32.xlu0 %v2141_v14  ;;  %3857 = vpow2.f32 %v2124_v60 }
 0x463   : > { %v834_v24 = vcombine.high %v4421_v27, %v680_v10  ;;  %v2144_v33 = vsel %vm2052_vm7, %v4456_v16, 0.0 }
 0x464   : > { %v1061_v22 = vrot.slane %v1053_v11, %v4163_v18  ;;  %v1068_v23 = vrot.slane %v1054_v12, %v4163_v18  ;;  %v4463_v52 = vpop.eup %3853  ;;  %v841_v29 = vrot.slane %v833_v13, %v4163_v18 }
 0x465   : > { %v689_v26 = vpop.permute.xlu0 %688  ;;  %v848_v38 = vrot.slane %v834_v24, %v4163_v18  ;;  %v2153_v43 = vsel %vm2052_vm7, %v4463_v52, 0.0 }
 0x466   : > { %v1069_v63 = vcombine.low %v1045_v17, %v1061_v22  ;;  %v1070_v20 = vcombine.high %v1045_v17, %v1061_v22  ;;  %v1085_v7 = vcombine.low %v1052_v19, %v1068_v23  ;;  %v1086_v28 = vcombine.high %v1052_v19, %v1068_v23  ;;  %683 = vrot.lane.b32.xlu1 %v4118_v58, %s3961_s22 }
 0x467   : > { %v849_v30 = vcombine.low %v4419_v25, %v689_v26  ;;  %v850_v32 = vcombine.high %v4419_v25, %v689_v26  ;;  %2145 = vadd.xlane.f32.xlu0 %v2144_v33 }
 0x468   : > { %v1077_v27 = vrot.slane %v1069_v63, %v4166_v21  ;;  %v1084_v34 = vrot.slane %v1070_v20, %v4166_v21  ;;  %v1093_v35 = vrot.slane %v1085_v7, %v4166_v21  ;;  %v1100_v37 = vrot.slane %v1086_v28, %v4166_v21  ;;  %v4481_v49 = vpop.eup %3855 }
 0x469   : > { %v857_v39 = vrot.slane %v849_v30, %v4163_v18  ;;  %v864_v25 = vrot.slane %v850_v32, %v4163_v18  ;;  %v2156_v61 = vsel %vm2052_vm7, %v4481_v49, 0.0 }
 0x46a   : > { %v1560_v46 = vcombine.low %v1077_v27, %v1084_v34  ;;  %v3431_v58 = vcombine.high %v1077_v27, %v1084_v34  ;;  %v1576_v47 = vcombine.low %v1093_v35, %v1100_v37  ;;  %v3432_v48 = vcombine.high %v1093_v35, %v1100_v37 }
 0x46b   : > { %v865_v53 = vcombine.low %v841_v29, %v857_v39  ;;  %v866_v55 = vcombine.high %v841_v29, %v857_v39  ;;  %v881_v57 = vcombine.low %v848_v38, %v864_v25  ;;  %v882_v59 = vcombine.high %v848_v38, %v864_v25  ;;  %2154 = vadd.xlane.f32.xlu0 %v2153_v43 }
 0x46c   : > { %v1567_v4 = vrot.slane %v1560_v46, %v4163_v18  ;;  %v1575_v5 = vrot.slane %v3431_v58, %v4163_v18  ;;  %v1583_v6 = vrot.slane %v1576_v47, %v4163_v18  ;;  %v1591_v8 = vrot.slane %v3432_v48, %v4163_v18  ;;  %v4493_v11 = vpop.eup %3857 }
 0x46d   : > { %v873_v9 = vrot.slane %v865_v53, %v4166_v21  ;;  %v880_v50 = vrot.slane %v866_v55, %v4166_v21  ;;  %v889_v51 = vrot.slane %v881_v57, %v4166_v21  ;;  %v896_v60 = vrot.slane %v882_v59, %v4166_v21 }
 0x46e   : > { %v1592_v10 = vcombine.low %v1567_v4, %v1575_v5  ;;  %v1608_v22 = vcombine.low %v1583_v6, %v1591_v8  ;;  %v1593_v23 = vcombine.high %v1567_v4, %v1575_v5  ;;  %v2159_v7 = vsel %vm2059_vm8, %v4493_v11, 0.0 }
 0x46f   : > { %v1492_v12 = vcombine.low %v873_v9, %v880_v50  ;;  %v3429_v13 = vcombine.high %v873_v9, %v880_v50  ;;  %v1508_v14 = vcombine.low %v889_v51, %v896_v60  ;;  %v3430_v17 = vcombine.high %v889_v51, %v896_v60  ;;  %2157 = vadd.xlane.f32.xlu0 %v2156_v61 }
 0x470   : > { %v1600_v19 = vrot.slane %v1592_v10, %v4166_v21  ;;  %v1616_v28 = vrot.slane %v1608_v22, %v4166_v21  ;;  %v1607_v29 = vrot.slane %v1593_v23, %v4166_v21  ;;  %v1609_v30 = vcombine.high %v1583_v6, %v1591_v8 }
 0x471   : > { %v1499_v24 = vrot.slane %v1492_v12, %v4163_v18  ;;  %v1507_v26 = vrot.slane %v3429_v13, %v4163_v18  ;;  %v1515_v63 = vrot.slane %v1508_v14, %v4163_v18  ;;  %v1523_v20 = vrot.slane %v3430_v17, %v4163_v18  ;;  %v666_v13 = vpop.permute.xlu0 %665  ;;  %v675_v14 = vpop.permute.xlu1 %674 }
 0x472   : > { %v2091_v35 = vsub.f32 %v4368_v54, %v4425_v62  ;;  %v1625_v37 = vcombine.high %v1600_v19, %v1616_v28  ;;  %v1623_v38 = vrot.slane %v1609_v30, %v4166_v21  ;;  %v1624_v58 = vcombine.low %v1600_v19, %v1616_v28 }
 0x473   : > { %v1524_v32 = vcombine.low %v1499_v24, %v1507_v26  ;;  %v1540_v33 = vcombine.low %v1515_v63, %v1523_v20  ;;  %v1525_v27 = vcombine.high %v1499_v24, %v1507_v26  ;;  %v1541_v34 = vcombine.high %v1515_v63, %v1523_v20  ;;  %2160 = vadd.xlane.f32.xlu0 %v2159_v7 }
 0x474   : > { %v1627_v47 = vcombine.high %v1607_v29, %v1623_v38  ;;  %v1626_v48 = vcombine.low %v1607_v29, %v1623_v38  ;;  %v2104_v54 = vmul.f32 1.442695, %v2091_v35  ;;  %v2092_v62 = vsub.f32 %v4374_v2, %v4427_v31 }
 0x475   : > { %v1532_v39 = vrot.slane %v1524_v32, %v4166_v21  ;;  %v1548_v25 = vrot.slane %v1540_v33, %v4166_v21  ;;  %v1539_v43 = vrot.slane %v1525_v27, %v4166_v21  ;;  %v1555_v46 = vrot.slane %v1541_v34, %v4166_v21  ;;  %v693_v17 = vpop.permute.xlu0 %692 }
 0x476   : > { %3859 = vpow2.f32 %v2104_v54  ;;  %v2106_v9 = vmul.f32 1.442695, %v2092_v62  ;;  %v2097_v50 = vsub.f32 %v4390_v41, %v4436_v45  ;;  %v2098_v2 = vsub.f32 %v4398_v15, %v4443_v56 }
 0x477   : > { %v1556_v53 = vcombine.low %v1532_v39, %v1548_v25  ;;  %v1557_v55 = vcombine.high %v1532_v39, %v1548_v25  ;;  %v1559_v57 = vcombine.high %v1539_v43, %v1555_v46  ;;  %v1558_v59 = vcombine.low %v1539_v43, %v1555_v46 }
 0x478   : > { %3861 = vpow2.f32 %v2106_v9  ;;  %v2116_v51 = vmul.f32 1.442695, %v2097_v50  ;;  %v2118_v31 = vmul.f32 1.442695, %v2098_v2  ;;  %v1162_v22 = vcombine.low %v675_v14, %v693_v17 }
 0x479   : > { %v3737_v4 = vpack.c.bf16 %v1624_v58, %v1556_v53  ;;  %v3740_v5 = vpack.c.bf16 %v1625_v37, %v1557_v55  ;;  %v4513_v6 = vpack.c.bf16 %v1627_v47, %v1559_v57  ;;  %v4515_v8 = vpack.c.bf16 %v1626_v48, %v1558_v59 }
 0x47a   : > { %3863 = vpow2.f32 %v2116_v51  ;;  %v1169_v63 = vrot.slane %v1162_v22, %v4163_v18 }
 0x47b   : > { %3738 = vmatpush3.bf16.msra.mxu0 %v3737_v4  ;;  %3750 = vmatpush3.bf16.msra.mxu1 %v3737_v4  ;;  %3865 = vpow2.f32 %v2118_v31 }
 0x47c   : > { %3636 = vmatprep.subr.mxu0 %v3956_v1  ;;  %3749 = vmatprep.subr.mxu1 %v3956_v1 }
 0x480   : > { %v4523_v60 = vpop.eup %3859 }
 0x481   : > { %v2129_v61 = vsel %vm2052_vm7, %v4523_v60, 0.0 }
 0x482   : > { %v4527_v10 = vpop.eup %3861 }
 0x483   : > { %v2132_v12 = vsel %vm2059_vm8, %v4527_v10, 0.0 }
 0x484   : > { %v4531_v41 = vpop.eup %3863 }
 0x485   : > { %v2147_v15 = vsel %vm2052_vm7, %v4531_v41, 0.0  ;;  %v4535_v45 = vpop.eup %3865 }
 0x486   : > { %v2150_v56 = vsel %vm2059_vm8, %v4535_v45, 0.0 }
 0x48a   : > { %2130 = vadd.xlane.f32.xlu1 %v2129_v61 }
 0x48e   : > { %2133 = vadd.xlane.f32.xlu1 %v2132_v12 }
 0x492   : > { %2148 = vadd.xlane.f32.xlu1 %v2147_v15 }
 0x496   : > { %2151 = vadd.xlane.f32.xlu1 %v2150_v56 }
 0x4e2   : > { %v2128_v19 = vpop.xlane.xlu1 %2127 }
 0x4e3   : > { %3867 = vrcp.f32 %v2128_v19  ;;  %v2137_v26 = vpop.xlane.xlu0 %2136 }
 0x4e4   : > { %3869 = vrcp.f32 %v2137_v26 }
 0x4e6   : > { %v684_v23 = vpop.permute.xlu1 %683 }
 0x4e7   : > { %v1154_v24 = vcombine.low %v666_v13, %v684_v23 }
 0x4e9   : > { %v1161_v20 = vrot.slane %v1154_v24, %v4163_v18 }
 0x4eb   : > { %v1170_v7 = vcombine.low %v1161_v20, %v1169_v63  ;;  %v2140_v28 = vpop.xlane.xlu0 %2139 }
 0x4ec   : > { %3871 = vrcp.f32 %v2140_v28 }
 0x4ed   : > { %v1634_v29 = vrot.slane %v1170_v7, %v4166_v21  ;;  %v3868_v30 = vpop.eup %3867 }
 0x4ee   : > { %v2174_v34 = vmul.f32 %v3868_v30, %v4432_v42  ;;  %v3870_v37 = vpop.eup %3869 }
 0x4ef   : > { %v1641_v32 = vrot.slane %v1634_v29, %v4163_v18  ;;  %v2143_v33 = vpop.xlane.xlu0 %2142  ;;  %v2177_v39 = vmul.f32 %v3870_v37, %v4434_v44 }
 0x4f0   : > { %3873 = vrcp.f32 %v2143_v33 }
 0x4f1   : > { %v1649_v27 = vrot.slane %v1641_v32, %v4166_v21  ;;  %v1642_v38 = vcombine.high %v1641_v32, %v3956_v1 }
 0x4f3   : > { %3637 = vmatpush3.msk.msra.mxu0 %vm2195_vm9, %v1649_v27  ;;  %3751 = vmatpush3.msk.msra.mxu1 %vm2195_vm9, %v1649_v27  ;;  %v1657_v42 = vcombine.high %v1649_v27, %v3956_v1  ;;  %v1656_v46 = vrot.slane %v1642_v38, %v4166_v21 }
 0x4f4   : > { %v2146_v35 = vpop.xlane.xlu0 %2145  ;;  %3639 = vmatmul.mubr.msk.f32.vlgmr.msra.gmra.mrb[16].mxu0 %vm2052_vm7, %v2174_v34  ;;  %3739 = vmatprep.subr.bf16.mxu0 %v3954_v0 }
 0x4f5   : > { %3741 = vmatpush3.bf16.msra.mxu0 %v3740_v5  ;;  %3653 = vmatprep.mubr.msk.f32.mxu0 %vm3955_vm4, %v3956_v1  ;;  %v1658_v48 = vcombine.high %v1656_v46, %v3956_v1 }
 0x4f6   : > { %3651 = vmatprep.subr.mxu0 %v3956_v1  ;;  %3742 = vmatprep.subr.bf16.mxu1 %v3954_v0  ;;  %v3872_v43 = vpop.eup %3871 }
 0x4f7   : > { %v2178_v47 = vmul.f32 %v3872_v43, %v4446_v3 }
 0x4f8   : > { %v2155_v25 = vpop.xlane.xlu0 %2154 }
 0x4f9   : > { %3875 = vrcp.f32 %v2155_v25  ;;  %3652 = vmatpush3.msk.msra.mxu0 %vm2195_vm9, %v1657_v42 }
 0x4fa   : > { %3654 = vmatmul.mubr.msk.f32.vlgmr.msra.gmra.mrb[18].mxu0 %vm2052_vm7, %v2177_v39  ;;  %3745 = vmatprep.subr.bf16.mxu0 %v3954_v0  ;;  %v3874_v44 = vpop.eup %3873 }
 0x4fb   : > { %3747 = vmatpush3.bf16.msra.mxu0 %v4513_v6  ;;  %3656 = vmatprep.mubr.msk.f32.mxu0 %vm3955_vm4, %v3956_v1  ;;  %v2179_v53 = vmul.f32 %v3874_v44, %v4451_v40 }
 0x4fc   : > { %v2158_v58 = vpop.xlane.xlu0 %2157  ;;  %3681 = vmatprep.subr.mxu0 %v3956_v1 }
 0x4fd   : > { %3877 = vrcp.f32 %v2158_v58 }
 0x4fe   : > { %3657 = vmatmul.mubr.msk.f32.gmra.mrb[20].mxu0 %vm2052_vm7, %v2178_v47 }
 0x4ff   : > { %3682 = vmatpush3.msk.msra.mxu0 %vm2195_vm9, %v1658_v48  ;;  %3659 = vmatprep.mubr.msk.f32.mxu0 %vm3955_vm4, %v3956_v1 }
 0x500   : > { %v2161_v0 = vpop.xlane.xlu0 %2160 }
 0x501   : > { %3879 = vrcp.f32 %v2161_v0 }
 0x502   : > { %3660 = vmatmul.mubr.msk.f32.gmra.mrb[22].mxu0 %vm2052_vm7, %v2179_v53 }
 0x503   : > { %v3876_v3 = vpop.eup %3875  ;;  %3683 = vmatprep.mubr.msk.f32.mxu0 %vm3955_vm4, %v3956_v1 }
 0x504   : > { %v2183_v55 = vmul.f32 %v3876_v3, %v4463_v52 }
 0x506   : > { %3684 = vmatmul.mubr.msk.f32.vlgmr.msra.gmra.mrb[24].mxu0 %vm2052_vm7, %v2183_v55 }
 0x507   : > { %v3878_v57 = vpop.eup %3877  ;;  %3686 = vmatprep.mubr.msk.f32.mxu0 %vm3955_vm4, %v3956_v1 }
 0x508   : > { %v2184_v59 = vmul.f32 %v3878_v57, %v4481_v49 }
 0x50a   : > { %3687 = vmatmul.mubr.msk.f32.gmra.mrb[26].mxu0 %vm2052_vm7, %v2184_v59 }
 0x50b   : > { %v3880_v40 = vpop.eup %3879  ;;  %3689 = vmatprep.mubr.msk.f32.mxu0 %vm3955_vm4, %v3956_v1 }
 0x50c   : > { %v2185_v54 = vmul.f32 %v3880_v40, %v4493_v11 }
 0x50e   : > { %3690 = vmatmul.mubr.msk.f32.gmra.mrb[28].mxu0 %vm2052_vm7, %v2185_v54 }
 0x517   : > { %v2131_v62 = vpop.xlane.xlu1 %2130 }
 0x518   : > { %3881 = vrcp.f32 %v2131_v62 }
 0x51b   : > { %v2134_v52 = vpop.xlane.xlu1 %2133 }
 0x51c   : > { %3883 = vrcp.f32 %v2134_v52 }
 0x51d   : > { %3885 = vrcp.f32 %v2146_v35 }
 0x51f   : > { %v2149_v4 = vpop.xlane.xlu1 %2148 }
 0x520   : > { %3887 = vrcp.f32 %v2149_v4 }
 0x522   : > { %v3882_v5 = vpop.eup %3881 }
 0x523   : > { %v2175_v49 = vmul.f32 %v3882_v5, %v4523_v60  ;;  %v2152_v6 = vpop.xlane.xlu1 %2151 }
 0x524   : > { %3889 = vrcp.f32 %v2152_v6 }
 0x525   : > { %3642 = vmatmul.mubr.msk.f32.vlgmr.msra.gmra.mrb[12].mxu1 %vm2052_vm7, %v2175_v49 }
 0x526   : > { %v3884_v9 = vpop.eup %3883  ;;  %3744 = vmatpush3.bf16.msra.mxu1 %v4515_v8  ;;  %3644 = vmatprep.mubr.msk.f32.mxu1 %vm3955_vm4, %v3956_v1 }
 0x527   : > { %3666 = vmatprep.subr.mxu1 %v3956_v1  ;;  %v2176_v11 = vmul.f32 %v3884_v9, %v4527_v10  ;;  %v3886_v50 = vpop.eup %3885 }
 0x528   : > { %v2180_v51 = vmul.f32 %v3886_v50, %v4456_v16 }
 0x529   : > { %3645 = vmatmul.mubr.msk.f32.gmra.mrb[14].mxu1 %vm2052_vm7, %v2176_v11 }
 0x52a   : > { %3667 = vmatpush3.msk.msra.mxu1 %vm2195_vm9, %v1656_v46  ;;  %3668 = vmatprep.mubr.msk.f32.mxu1 %vm3955_vm4, %v3956_v1  ;;  %v3888_v2 = vpop.eup %3887 }
 0x52b   : > { %v2181_v8 = vmul.f32 %v3888_v2, %v4531_v41 }
 0x52d   : > { %3669 = vmatmul.mubr.msk.f32.vlgmr.msra.gmra.mrb[16].mxu1 %vm2052_vm7, %v2180_v51 }
 0x52e   : > { %3671 = vmatprep.mubr.msk.f32.mxu1 %vm3955_vm4, %v3956_v1  ;;  %v3890_v31 = vpop.eup %3889 }
 0x52f   : > { %v2182_v60 = vmul.f32 %v3890_v31, %v4535_v45 }
 0x531   : > { %3672 = vmatmul.mubr.msk.f32.gmra.mrb[18].mxu1 %vm2052_vm7, %v2181_v8 }
 0x532   : > { %3674 = vmatprep.mubr.msk.f32.mxu1 %vm3955_vm4, %v3956_v1 }
 0x535   : > { %3675 = vmatmul.mubr.msk.f32.gmra.mrb[20].mxu1 %vm2052_vm7, %v2182_v60 }
 0x5c7   : > { %v2265_v61 = vpop.f32.mrb[16].mxu0 }
 0x5c8   : > { %v3640_v16 = vpop.f32.mrb[17].mxu0 }
 0x5cd   : > { %v2357_v10 = vpop.f32.mrb[18].mxu0 }
 0x5ce   : > { %v3655_v12 = vpop.f32.mrb[19].mxu0 }
 0x5d1   : > { %v2362_v15 = vpop.f32.mrb[20].mxu0 }
 0x5d2   : > { %v3658_v56 = vpop.f32.mrb[21].mxu0 }
 0x5d5   : > { %v2367_v13 = vpop.f32.mrb[22].mxu0 }
 0x5d6   : > { %v3661_v14 = vpop.f32.mrb[23].mxu0 }
 0x5d9   : > { %v2541_v17 = vpop.f32.mrb[24].mxu0 }
 0x5da   : > { %v2571_v41 = vcombine.low %v2357_v10, %v2541_v17  ;;  %v2572_v19 = vcombine.high %v2357_v10, %v2541_v17  ;;  %v3685_v22 = vpop.f32.mrb[25].mxu0 }
 0x5dc   : > { %v2579_v37 = vrot.slane %v2571_v41, %v4163_v18  ;;  %v2586_v38 = vrot.slane %v2572_v19, %v4163_v18 }
 0x5dd   : > { %v2546_v23 = vpop.f32.mrb[26].mxu0 }
 0x5de   : > { %v2639_v24 = vcombine.low %v2362_v15, %v2546_v23  ;;  %v2640_v26 = vcombine.high %v2362_v15, %v2546_v23  ;;  %v3688_v63 = vpop.f32.mrb[27].mxu0 }
 0x5e0   : > { %v2647_v48 = vrot.slane %v2639_v24, %v4163_v18  ;;  %v2654_v40 = vrot.slane %v2640_v26, %v4163_v18 }
 0x5e1   : > { %v2551_v20 = vpop.f32.mrb[28].mxu0 }
 0x5e2   : > { %v2699_v45 = vcombine.low %v2367_v13, %v2551_v20  ;;  %v3691_v7 = vpop.f32.mrb[29].mxu0 }
 0x5e4   : > { %v2706_v54 = vrot.slane %v2699_v45, %v4163_v18 }
 0x5f8   : > { %v2270_v28 = vpop.f32.mrb[12].mxu1 }
 0x5f9   : > { %v3643_v29 = vpop.f32.mrb[13].mxu1 }
 0x5fc   : > { %v2275_v30 = vpop.f32.mrb[14].mxu1 }
 0x5fd   : > { %v3646_v32 = vpop.f32.mrb[15].mxu1 }
 0x600   : > { %v2449_v33 = vpop.f32.mrb[16].mxu1 }
 0x601   : > { %v2555_v27 = vcombine.low %v2265_v61, %v2449_v33  ;;  %v2556_v34 = vcombine.high %v2265_v61, %v2449_v33  ;;  %v3670_v35 = vpop.f32.mrb[17].mxu1 }
 0x602   : > { %v3829_v35 = vld [vmem:[%s4063_s26] sm:$0xff]  }
 0x603   : > { %v2563_v42 = vrot.slane %v2555_v27, %v4163_v18  ;;  %v2570_v39 = vrot.slane %v2556_v34, %v4163_v18  ;;  %3692 = vmatprep.subr.bf16.mxu1 %v3829_v35 }
 0x604   : > { %v2454_v25 = vpop.f32.mrb[18].mxu1  ;;  %3693 = vmatpush3.bf16.msra.mxu1 %v3829_v35 }
 0x605   : > { %v2587_v43 = vcombine.low %v2563_v42, %v2579_v37  ;;  %v2588_v46 = vcombine.high %v2563_v42, %v2579_v37  ;;  %v2603_v58 = vcombine.low %v2570_v39, %v2586_v38  ;;  %v2604_v47 = vcombine.high %v2570_v39, %v2586_v38  ;;  %v3673_v44 = vpop.f32.mrb[19].mxu1 }
 0x606   : > { %v2623_v0 = vcombine.low %v2270_v28, %v2454_v25  ;;  %v2624_v53 = vcombine.high %v2270_v28, %v2454_v25 }
 0x607   : > { %v2595_v3 = vrot.slane %v2587_v43, %v4166_v21  ;;  %v2602_v55 = vrot.slane %v2588_v46, %v4166_v21  ;;  %v2611_v57 = vrot.slane %v2603_v58, %v4166_v21  ;;  %v2618_v59 = vrot.slane %v2604_v47, %v4166_v21 }
 0x608   : > { %v2631_v62 = vrot.slane %v2623_v0, %v4163_v18  ;;  %v2638_v52 = vrot.slane %v2624_v53, %v4163_v18  ;;  %v2459_v4 = vpop.f32.mrb[20].mxu1 }
 0x609   : > { %v2708_v5 = vcombine.low %v2595_v3, %v2602_v55  ;;  %v3473_v49 = vcombine.high %v2595_v3, %v2602_v55  ;;  %v2724_v6 = vcombine.low %v2611_v57, %v2618_v59  ;;  %v3474_v9 = vcombine.high %v2611_v57, %v2618_v59  ;;  %v3676_v11 = vpop.f32.mrb[21].mxu1 }
 0x60a   : > { %v2655_v50 = vcombine.low %v2631_v62, %v2647_v48  ;;  %v2656_v51 = vcombine.high %v2631_v62, %v2647_v48  ;;  %v2671_v2 = vcombine.low %v2638_v52, %v2654_v40  ;;  %v2672_v8 = vcombine.high %v2638_v52, %v2654_v40  ;;  %v3830_v62 = vld [vmem:[%s4063_s26 + $0x8] sm:$0xff]  }
 0x60b   : > { %v2715_v31 = vrot.slane %v2708_v5, %v4163_v18  ;;  %v2723_v60 = vrot.slane %v3473_v49, %v4163_v18  ;;  %v2731_v61 = vrot.slane %v2724_v6, %v4163_v18  ;;  %v2739_v16 = vrot.slane %v3474_v9, %v4163_v18  ;;  %3694 = vmatprep.subr.bf16.mxu1 %v3830_v62 }
 0x60c   : > { %v2663_v10 = vrot.slane %v2655_v50, %v4166_v21  ;;  %v2670_v12 = vrot.slane %v2656_v51, %v4166_v21  ;;  %v2679_v15 = vrot.slane %v2671_v2, %v4166_v21  ;;  %v2686_v56 = vrot.slane %v2672_v8, %v4166_v21  ;;  %3695 = vmatpush3.bf16.msra.mxu1 %v3830_v62 }
 0x60d   : > { %v2691_v13 = vcombine.low %v2275_v30, %v2459_v4  ;;  %v2740_v14 = vcombine.low %v2715_v31, %v2723_v60  ;;  %v2756_v17 = vcombine.low %v2731_v61, %v2739_v16  ;;  %v2741_v41 = vcombine.high %v2715_v31, %v2723_v60 }
 0x60e   : > { %v2776_v19 = vcombine.low %v2663_v10, %v2670_v12  ;;  %v3475_v22 = vcombine.high %v2663_v10, %v2670_v12  ;;  %v2792_v23 = vcombine.low %v2679_v15, %v2686_v56  ;;  %v3476_v24 = vcombine.high %v2679_v15, %v2686_v56 }
 0x60f   : > { %v2698_v26 = vrot.slane %v2691_v13, %v4163_v18  ;;  %v4628_v63 = vrot.slane %v2740_v14, %v4166_v21  ;;  %v4631_v20 = vrot.slane %v2756_v17, %v4166_v21  ;;  %v2755_v45 = vrot.slane %v2741_v41, %v4166_v21 }
 0x610   : > { %v2783_v7 = vrot.slane %v2776_v19, %v4163_v18  ;;  %v2791_v28 = vrot.slane %v3475_v22, %v4163_v18  ;;  %v2799_v29 = vrot.slane %v2792_v23, %v4163_v18  ;;  %v2807_v30 = vrot.slane %v3476_v24, %v4163_v18 }
 0x611   : > { %v2707_v32 = vcombine.low %v2698_v26, %v2706_v54  ;;  %v2772_v33 = vcombine.low %v4628_v63, %v4631_v20  ;;  %v2773_v27 = vcombine.high %v4628_v63, %v4631_v20  ;;  %v2757_v34 = vcombine.high %v2731_v61, %v2739_v16  ;;  %v4663_v26 = vld [vmem:[%s4084_s25] sm:$0x3f] }
 0x612   : > { %v2808_v37 = vcombine.low %v2783_v7, %v2791_v28  ;;  %v2824_v38 = vcombine.low %v2799_v29, %v2807_v30  ;;  %v2809_v42 = vcombine.high %v2783_v7, %v2791_v28  ;;  %v2825_v39 = vcombine.high %v2799_v29, %v2807_v30 }
 0x613   : > { %v2850_v25 = vrot.slane %v2707_v32, %v4166_v21  ;;  %v2771_v43 = vrot.slane %v2757_v34, %v4166_v21  ;;  %v2930_v24 = vsub.s32 4, %v4106_v36  ;;  %v3904_v32 = vld [vmem:[%s4089_s14] sm:$0xff]  ;;  %v3905_v34 = vld [vmem:[%s4089_s14 + $0x8] sm:$0xff] }
 0x614   : > { %v2816_v46 = vrot.slane %v2808_v37, %v4166_v21  ;;  %v2832_v58 = vrot.slane %v2824_v38, %v4166_v21  ;;  %v2823_v47 = vrot.slane %v2809_v42, %v4166_v21  ;;  %v2839_v44 = vrot.slane %v2825_v39, %v4166_v21  ;;  %v3906_v38 = vld [vmem:[%s4089_s14 + $0x10] sm:$0x1] }
 0x615   : > { %v2857_v48 = vrot.slane %v2850_v25, %v4163_v18  ;;  %v2774_v0 = vcombine.low %v2755_v45, %v2771_v43  ;;  %v2775_v53 = vcombine.high %v2755_v45, %v2771_v43  ;;  %v2931_v63 = vrot.slane %v4663_v26, %v2930_v24  ;;  %v3833_v24 = vld [vmem:[%s4078_s21] sm:$0xff]  }
 0x616   : > { %v2841_v3 = vcombine.high %v2816_v46, %v2832_v58  ;;  %v2840_v55 = vcombine.low %v2816_v46, %v2832_v58  ;;  %v2842_v57 = vcombine.low %v2823_v47, %v2839_v44  ;;  %v2843_v59 = vcombine.high %v2823_v47, %v2839_v44  ;;  %3708 = vmatprep.subr.bf16.mxu1 %v3833_v24 }
 0x617   : > { %v2865_v40 = vrot.slane %v2857_v48, %v4166_v21  ;;  %v2858_v54 = vcombine.high %v2857_v48, %v3956_v1 }
 0x618   : > { %v3812_v52 = vpack.i.bf16 %v2841_v3, %v2773_v27  ;;  %v3817_v4 = vpack.i.bf16 %v2842_v57, %v2774_v0  ;;  %v3822_v5 = vpack.i.bf16 %v2843_v59, %v2775_v53 }
 0x619   : > { %v2873_v49 = vcombine.high %v2865_v40, %v3956_v1  ;;  %v2872_v6 = vrot.slane %v2858_v54, %v4166_v21 }
 0x61a   : > { %3813 = vrot.lane.b32.xlu1 %v3812_v52, %s3963_s11  ;;  %v3831_v52 = vld [vmem:[%s4068_s10] sm:$0xff]  }
 0x61b   : > { %2882 = vrot.lane.b32.xlu0 %v2873_v49, %s3963_s11  ;;  %v2874_v18 = vcombine.high %v2872_v6, %v3956_v1  ;;  %3700 = vmatprep.subr.bf16.mxu0 %v3831_v52 }
 0x61c   : > { %3701 = vmatpush3.bf16.msra.mxu0 %v3831_v52 }
 0x61e   : > { %3818 = vrot.lane.b32.xlu1 %v3817_v4, %s3964_s0  ;;  %v3832_v4 = vld [vmem:[%s4068_s10 + $0x8] sm:$0xff]  }
 0x61f   : > { %2906 = vrot.lane.b32.xlu0 %v2874_v18, %s3965_s1  ;;  %3702 = vmatprep.subr.bf16.mxu0 %v3832_v4 }
 0x620   : > { %3703 = vmatpush3.bf16.msra.mxu0 %v3832_v4 }
 0x622   : > { %2894 = vrot.lane.b32.xlu1 %v2872_v6, %s3964_s0 }
 0x626   : > { %3823 = vrot.lane.b32.xlu1 %v3822_v5, %s3965_s1 }
 0x68c   : > { %v3814_v9 = vpop.permute.xlu1 %3813 }
 0x68d   : > { %v2883_v50 = vpop.permute.xlu0 %2882  ;;  %v3816_v2 = vunpack.i.h.bf16 %v3814_v9  ;;  %v3815_v8 = vunpack.i.l.bf16 %v3814_v9 }
 0x68e   : > { %v2913_v21 = vsel %vm1659_vm5, %v2865_v40, %v2883_v50 }
 0x68f   : > { %v2911_v16 = vsel %vm1659_vm5, %v2772_v33, %v3815_v8  ;;  %v2912_v10 = vsel %vm1659_vm5, %v2840_v55, %v3816_v2  ;;  %v3042_v8 = vsub.s32 2, %v4106_v36 }
 0x690   : > { %v3819_v11 = vpop.permute.xlu1 %3818 }
 0x691   : > { %v3821_v31 = vunpack.i.h.bf16 %v3819_v11  ;;  %v3820_v60 = vunpack.i.l.bf16 %v3819_v11  ;;  %v2907_v12 = vpop.permute.xlu0 %2906 }
 0x693   : > { %v2915_v13 = vsel %vm2914_vm10, %v2911_v16, %v3820_v60  ;;  %v2916_v14 = vsel %vm2914_vm10, %v2912_v10, %v3821_v31  ;;  %v3049_v31 = vsub.s32 3, %v4106_v36 }
 0x694   : > { %v2895_v51 = vpop.permute.xlu1 %2894 }
 0x695   : > { %v2917_v61 = vsel %vm2914_vm10, %v2913_v21, %v2895_v51  ;;  %v3043_v21 = vrot.slane %v4663_v26, %v3042_v8 }
 0x696   : > { %v2921_v17 = vsel %vm2918_vm11, %v2917_v61, %v2907_v12  ;;  %v3050_v12 = vrot.slane %v4663_v26, %v3049_v31 }
 0x697   : > { %v2923_v23 = vpack.c.bf16 %v2921_v17, %v2921_v17 }
 0x698   : > { %v3824_v1 = vpop.permute.xlu1 %3823 }
 0x699   : > { %v3826_v15 = vunpack.i.h.bf16 %v3824_v1  ;;  %v3825_v56 = vunpack.i.l.bf16 %v3824_v1 }
 0x69b   : > { %v2920_v41 = vsel %vm2918_vm11, %v2916_v14, %v3826_v15  ;;  %v2919_v19 = vsel %vm2918_vm11, %v2915_v13, %v3825_v56 }
 0x69c   : > { %v2922_v22 = vpack.c.bf16 %v2920_v41, %v2919_v19 }
 0x69e   : > { %3696 = vmatprep.mubr.msk.bf16.mxu1 %vm460_vm2, %v2922_v22 }
 0x69f   : > { %3697 = vmatmul.mubr.msk.bf16.vlgmr.msra.gmra.mrb[24].mxu1 %vm460_vm2, %v2923_v23 }
 0x6a0   : > { %3709 = vmatpush3.bf16.msra.mxu1 %v3833_v24 }
 0x772   : > { %v3698_v20 = vpop.f32.mrb[24].mxu1 }
 0x773   : > { %v2984_v45 = vpop.f32.mrb[25].mxu1  ;;  %v2993_v30 = vadd.f32 %v3698_v20, %v2931_v63  ;;  %v3835_v20 = vld [vmem:[%s4078_s21 + $0x10] sm:$0xff]  }
 0x774   : > { %v2985_v7 = vadd.f32 %v2984_v45, %v2931_v63  ;;  %v3699_v28 = vpop.f32.mrb[26].mxu1  ;;  %v3836_v45 = vld [vmem:[%s4078_s21 + $0x18] sm:$0xff]  }
 0x775   : > { %v2987_v29 = vpop.f32.mrb[27].mxu1  ;;  %v4675_v42 = vadd.f32 %v3906_v38, %v2993_v30 }
 0x776   : > { %v4667_v33 = vadd.f32 %v3904_v32, %v2985_v7  ;;  %v2988_v27 = vadd.f32 %v2987_v29, %v2931_v63  ;;  %v3834_v63 = vld [vmem:[%s4078_s21 + $0x8] sm:$0xff]   ;;  %v3481_v7 = vld [vmem:[%s428_s18] ss:$0 sm:$0xff] }
 0x777   : > { %v3007_v25 = vsel %vm467_vm3, %v4675_v42, 0.0  ;;  %3710 = vmatprep.subr.bf16.mxu1 %v3834_v63 }
 0x778   : > { %v4670_v35 = vadd.f32 %v3905_v34, %v2988_v27  ;;  %v3001_v37 = vsel %vm460_vm2, %v4667_v33, 0.0  ;;  %3711 = vmatpush3.bf16.msra.mxu1 %v3834_v63 }
 0x779   : > { %3002 = vadd.xlane.f32.xlu1 %v3001_v37  ;;  %3712 = vmatprep.subr.bf16.mxu1 %v3835_v20 }
 0x77a   : > { %v3004_v39 = vsel %vm460_vm2, %v4670_v35, 0.0 }
 0x77b   : > { %3005 = vadd.xlane.f32.xlu0 %v3004_v39 }
 0x77c   : > { %3713 = vmatpush3.bf16.msra.mxu1 %v3835_v20 }
 0x77d   : > { %3714 = vmatprep.subr.bf16.mxu1 %v3836_v45 }
 0x77f   : > { %3008 = vadd.xlane.f32.xlu0 %v3007_v25 }
 0x780   : > { %3715 = vmatpush3.bf16.msra.mxu1 %v3836_v45 }
 0x806   : > { %v3003_v43 = vpop.xlane.xlu1 %3002 }
 0x807   : > { %v3010_v46 = vmul.f32 0.03125, %v3003_v43 }
 0x808   : > { %v3006_v58 = vpop.xlane.xlu0 %3005 }
 0x809   : > { %v3013_v47 = vsub.f32 %v4667_v33, %v3010_v46  ;;  %v3011_v44 = vmul.f32 0.03125, %v3006_v58 }
 0x80b   : > { %v3014_v48 = vsub.f32 %v4670_v35, %v3011_v44  ;;  %v3016_v0 = vmul.f32 %v3013_v47, %v3013_v47 }
 0x80c   : > { %v3009_v53 = vpop.xlane.xlu0 %3008 }
 0x80d   : > { %v3012_v3 = vmul.f32 0.03125, %v3009_v53  ;;  %v3019_v55 = vsel %vm460_vm2, %v3016_v0, 0.0  ;;  %v3017_v57 = vmul.f32 %v3014_v48, %v3014_v48 }
 0x80e   : > { %3020 = vadd.xlane.f32.xlu0 %v3019_v55 }
 0x80f   : > { %v3015_v59 = vsub.f32 %v4675_v42, %v3012_v3  ;;  %v3022_v40 = vsel %vm460_vm2, %v3017_v57, 0.0 }
 0x810   : > { %3023 = vadd.xlane.f32.xlu1 %v3022_v40 }
 0x811   : > { %v3018_v54 = vmul.f32 %v3015_v59, %v3015_v59 }
 0x813   : > { %v3025_v62 = vsel %vm467_vm3, %v3018_v54, 0.0 }
 0x814   : > { %3026 = vadd.xlane.f32.xlu0 %v3025_v62  ;;  %v3160_v62 = vsub.s32 5, %v4106_v36 }
 0x816   : > { %v3161_v52 = vrot.slane %v4663_v26, %v3160_v62 }
 0x89b   : > { %v3021_v5 = vpop.xlane.xlu0 %3020 }
 0x89c   : > { %v3028_v49 = vmul.f32 0.03125, %v3021_v5 }
 0x89d   : > { %v3024_v6 = vpop.xlane.xlu1 %3023 }
 0x89e   : > { %v3031_v18 = vadd.f32 1e-12, %v3028_v49  ;;  %v3029_v9 = vmul.f32 0.03125, %v3024_v6 }
 0x8a0   : > { %3891 = vrsqrt.f32 %v3031_v18  ;;  %v3032_v11 = vadd.f32 1e-12, %v3029_v9 }
 0x8a1   : > { %v3027_v50 = vpop.xlane.xlu0 %3026 }
 0x8a2   : > { %3893 = vrsqrt.f32 %v3032_v11  ;;  %v3030_v51 = vmul.f32 0.03125, %v3027_v50 }
 0x8a4   : > { %v3033_v2 = vadd.f32 1e-12, %v3030_v51 }
 0x8a6   : > { %3895 = vrsqrt.f32 %v3033_v2 }
 0x8aa   : > { %v3892_v60 = vpop.eup %3891 }
 0x8ab   : > { %v3037_v61 = vmul.f32 %v3892_v60, %v3013_v47 }
 0x8ac   : > { %v3894_v1 = vpop.eup %3893 }
 0x8ad   : > { %v3038_v16 = vmul.f32 %v3894_v1, %v3014_v48  ;;  %v3044_v10 = vmul.f32 %v3043_v21, %v3037_v61 }
 0x8af   : > { %v3045_v15 = vmul.f32 %v3043_v21, %v3038_v16  ;;  %v3051_v14 = vadd.f32 %v3050_v12, %v3044_v10 }
 0x8b0   : > { %v3896_v56 = vpop.eup %3895 }
 0x8b1   : > { %v3039_v13 = vmul.f32 %v3896_v56, %v3015_v59  ;;  %v3052_v17 = vadd.f32 %v3050_v12, %v3045_v15 }
 0x8b3   : > { %v3046_v41 = vmul.f32 %v3043_v21, %v3039_v13  ;;  %v3054_v19 = vpack.c.bf16 %v3052_v17, %v3051_v14 }
 0x8b5   : > { %3704 = vmatprep.mubr.msk.bf16.mxu0 %vm460_vm2, %v3054_v19  ;;  %v3053_v22 = vadd.f32 %v3050_v12, %v3046_v41 }
 0x8b7   : > { %v3055_v23 = vpack.c.bf16 %v3053_v22, %v3053_v22 }
 0x8b9   : > { %3705 = vmatmul.mubr.msk.bf16.vlgmr.msra.gmra.mrb[32].mxu0 %vm460_vm2, %v3055_v23 }
 0x98c   : > { %v3706_v28 = vpop.f32.mrb[32].mxu0 }
 0x98d   : > { %v3128_v29 = vadd.f32 %v3706_v28, %v3481_v7  ;;  %v3119_v30 = vpop.f32.mrb[33].mxu0 }
 0x98e   : > { %v3120_v32 = vadd.f32 %v3481_v7, %v3119_v30  ;;  %v3707_v27 = vpop.f32.mrb[34].mxu0 }
 0x98f   : > { %v3138_v34 = vmul.f32 0.70710677, %v3128_v29  ;;  %v3122_v37 = vpop.f32.mrb[35].mxu0  ;;  %v3135_v48 = vmul.f32 0.5, %v3128_v29 }
 0x990   : > { %v3136_v38 = vmul.f32 0.70710677, %v3120_v32  ;;  %v3123_v39 = vadd.f32 %v3481_v7, %v3122_v37  ;;  %v3133_v0 = vmul.f32 0.5, %v3120_v32 }
 0x991   : > { %3897 = verf.f32 %v3138_v34 }
 0x992   : > { %3899 = verf.f32 %v3136_v38  ;;  %v3137_v25 = vmul.f32 0.70710677, %v3123_v39  ;;  %v3134_v53 = vmul.f32 0.5, %v3123_v39 }
 0x994   : > { %3901 = verf.f32 %v3137_v25 }
 0x99b   : > { %v3898_v43 = vpop.eup %3897 }
 0x99c   : > { %v3900_v46 = vpop.eup %3899  ;;  %v3144_v58 = vadd.f32 1.0, %v3898_v43 }
 0x99d   : > { %v3142_v47 = vadd.f32 1.0, %v3900_v46 }
 0x99e   : > { %v3902_v44 = vpop.eup %3901  ;;  %v3147_v55 = vmul.f32 %v3144_v58, %v3135_v48 }
 0x99f   : > { %v3143_v3 = vadd.f32 1.0, %v3902_v44  ;;  %v3145_v57 = vmul.f32 %v3142_v47, %v3133_v0 }
 0x9a0   : > { %v3149_v54 = vpack.c.bf16 %v3147_v55, %v3147_v55 }
 0x9a1   : > { %v3146_v59 = vmul.f32 %v3143_v3, %v3134_v53 }
 0x9a3   : > { %v3148_v40 = vpack.c.bf16 %v3146_v59, %v3145_v57 }
 0x9a5   : > { %3716 = vmatprep.mubr.msk.bf16.mxu1 %vm3186_vm12, %v3148_v40 }
 0x9a6   : > { %3717 = vmatmul.mubr.msk.bf16.vlgmr.msra.gmra.mrb[28].mxu1 %vm3186_vm12, %v3149_v54 }
 0xa79   : > { %v3718_v4 = vpop.f32.mrb[28].mxu1 }
 0xa7a   : > { %v3236_v5 = vadd.f32 %v3718_v4, %v3161_v52  ;;  %v3227_v49 = vpop.f32.mrb[29].mxu1 }
 0xa7b   : > { %v3228_v6 = vadd.f32 %v3227_v49, %v3161_v52  ;;  %v3719_v18 = vpop.f32.mrb[30].mxu1 }
 0xa7c   : > { %v3243_v9 = vadd.f32 %v3236_v5, %v4675_v42  ;;  %v3230_v11 = vpop.f32.mrb[31].mxu1 }
 0xa7d   : > { %v3241_v50 = vadd.f32 %v3228_v6, %v4667_v33  ;;  %v3231_v51 = vadd.f32 %v3230_v11, %v3161_v52 }
 0xa7e   : > { %3246 = vst.msk [vmem:[%s4089_s14 + $0x10] sm:$0x1] %vm467_vm3, %v3243_v9 }
 0xa7f   : > { %3244 = vst.msk [vmem:[%s4089_s14] sm:$0xff] %vm460_vm2, %v3241_v50  ;;  %v3242_v2 = vadd.f32 %v3231_v51, %v4670_v35 }
 0xa81   : > { %3245 = vst.msk [vmem:[%s4089_s14 + $0x8] sm:$0xff] %vm460_vm2, %v3242_v2 }
 0xa82 PF: > { %s18_s9 = sadd.s32 1, %s3945_s9   ;;  %s4750_s12 = sld [smem:[#allocation2_spill]] }
 0xa83   : > { %p15_p8 = scmp.ge.s32.totalorder %s18_s9, 6   ;;  %s4751_s18 = sld [smem:[#allocation3_spill]] }
 0xa84   : > { %s4752_s27 = smov %s3937_s29  ;;  %s4753_s28 = smov %s3941_s30 }
 0xa85   :  { %17 = sbr.rel (!%p15_p8) target bundleno = 4 (0x4), region = 107 }
 0xa88   : > { %s4754_s29 = smov %s4750_s12 }
 0xa89   : > { %s4755_s30 = smov %s4751_s18 }

</bundles_post_ra>
